<compile_context>
chip_gen: v7x
topology: tpu7x:2x2x1
jax: 0.10.0
libtpu: 0.0.40
codegen_flags: <defaults>
</compile_context>

<pallas_src>
import functools

import jax
import jax.numpy as jnp
from jax import lax
from jax.experimental import pallas as pl
from jax.experimental.pallas import tpu as pltpu


def _dec_kernel(x_ref, w1_ref, b1_ref, w2_ref, b2_ref, ct_ref, cc_ref,
                z_ref, q_ref):
    # --- encoder: Linear -> ReLU -> Linear (MXU matmuls, f32 accumulate) ---
    x = x_ref[...]                                            # (tm, D_in)
    h = jnp.dot(x, w1_ref[...], preferred_element_type=jnp.float32)
    h = jnp.maximum(h + b1_ref[...], 0.0)                     # bias + ReLU (f32)
    z = jnp.dot(h.astype(w2_ref.dtype), w2_ref[...],
                preferred_element_type=jnp.float32)
    z = z + b2_ref[...]                                       # (tm, L), f32
    z_ref[...] = z.astype(z_ref.dtype)

    # --- soft assignment ---
    # dist[i,j] = ||z_i||^2 + ||c_j||^2 - 2 z_i.c_j
    # Clusters are pre-transposed to (L, Kp) and ||c||^2 precomputed (1, Kp)
    # in the wrapper; padded columns of ||c||^2 hold 1e34 so their q
    # underflows to exactly 0 before the row normalization (no in-kernel mask).
    zc = jnp.dot(z.astype(ct_ref.dtype), ct_ref[...],
                 preferred_element_type=jnp.float32)           # (tm, Kp)
    zz = jnp.sum(z * z, axis=-1, keepdims=True)                # (tm, 1)
    dist = jnp.maximum(zz + cc_ref[...] - 2.0 * zc, 0.0)       # clamp cancellation

    r = lax.rsqrt(1.0 + dist)                                  # (1+d)^-0.5 (EUP)
    q = r * r * r                                              # (1+d)^-1.5 == q**1.5
    denom = jnp.sum(q, axis=-1, keepdims=True)
    q_ref[...] = (q / denom).astype(q_ref.dtype)               # exact normalization


def _round_up(a, b):
    return pl.cdiv(a, b) * b


@functools.partial(
    jax.jit, static_argnames=("tm", "use_bf16", "single_buffer_consts"))
def dec_forward(x, w1, b1, w2, b2, clusters, *, tm=512, use_bf16=True,
                single_buffer_consts=True):
    N, d_in = x.shape
    latent = w1.shape[1]
    k = clusters.shape[0]

    b1_c = b1.reshape(1, latent).astype(jnp.float32)
    b2_c = b2.reshape(1, latent).astype(jnp.float32)

    # Row tile: multiple of 8 (sublane), no larger than the padded batch.
    tm_eff = min(_round_up(tm, 8), _round_up(N, 8))
    n_steps = pl.cdiv(N, tm_eff)
    if n_steps < 2 and N > 8:
        # Keep >= 2 grid steps so v7x's two TensorCores both get work
        # (the "parallel" row axis is sharded across cores).
        tm_eff = max(8, _round_up(pl.cdiv(N, 2), 8))
        n_steps = pl.cdiv(N, tm_eff)
    n_pad = n_steps * tm_eff

    # Lane-dense q output: pad cluster count up to a multiple of 128.
    k_pad = _round_up(k, 128)

    in_dtype = jnp.bfloat16 if use_bf16 else jnp.float32

    x_p = jnp.pad(x, ((0, n_pad - N), (0, 0))).astype(in_dtype)
    clusters_p = jnp.pad(clusters, ((0, k_pad - k), (0, 0)))
    clusters_t = clusters_p.T.astype(in_dtype)                   # (L, Kp)
    # ||c||^2 from the matmul-dtype clusters (consistent with z @ C^T);
    # padded columns get a huge value so their q flushes to 0 in the kernel.
    c_f32 = clusters_t.astype(jnp.float32)
    cc = jnp.sum(c_f32 * c_f32, axis=0, keepdims=True)           # (1, Kp)
    if k < k_pad:
        cc = cc.at[:, k:].set(jnp.float32(1e34))
    w1_c = w1.astype(in_dtype)
    w2_c = w2.astype(in_dtype)

    # Grid-invariant operands: single-buffer (constant index_map).
    pm = pl.Buffered(1) if (single_buffer_consts
                            and hasattr(pl, "Buffered")) else None

    def _const_spec(shape):
        if pm is None:
            return pl.BlockSpec(shape, lambda i: (0, 0))
        return pl.BlockSpec(shape, lambda i: (0, 0), pipeline_mode=pm)

    # VMEM budget: double-buffered x/z/q tiles + constants at their real count.
    ib = jnp.dtype(in_dtype).itemsize
    const_bufs = 1 if pm is not None else 2
    const_bytes = ((d_in * latent + latent * latent + latent * k_pad) * ib
                   + (2 * latent + k_pad) * 4)
    tile_bytes = (tm_eff * d_in * ib         # x tile
                  + tm_eff * latent * 4      # z tile
                  + tm_eff * k_pad * 4)      # q tile
    vmem_needed = 2 * tile_bytes + const_bufs * const_bytes
    vmem_limit = min(max(int(vmem_needed * 1.5) + (4 << 20), 16 << 20),
                     100 << 20)

    cost = pl.CostEstimate(
        flops=2 * n_pad * (d_in * latent + latent * latent + latent * k_pad)
              + 10 * n_pad * k_pad,
        transcendentals=n_pad * k_pad,
        bytes_accessed=(n_pad * d_in * ib + const_bytes
                        + n_pad * latent * 4 + n_pad * k_pad * 4),
    )

    z_p, q_p = pl.pallas_call(
        _dec_kernel,
        out_shape=(
            jax.ShapeDtypeStruct((n_pad, latent), jnp.float32),
            jax.ShapeDtypeStruct((n_pad, k_pad), jnp.float32),
        ),
        grid_spec=pltpu.PrefetchScalarGridSpec(
            num_scalar_prefetch=0,
            grid=(n_steps,),
            in_specs=[
                pl.BlockSpec((tm_eff, d_in), lambda i: (i, 0)),    # x tile
                _const_spec((d_in, latent)),                       # W1
                _const_spec((1, latent)),                          # b1
                _const_spec((latent, latent)),                     # W2
                _const_spec((1, latent)),                          # b2
                _const_spec((latent, k_pad)),                      # clusters^T
                _const_spec((1, k_pad)),                           # ||c||^2
            ],
            out_specs=[
                pl.BlockSpec((tm_eff, latent), lambda i: (i, 0)),  # z tile
                pl.BlockSpec((tm_eff, k_pad), lambda i: (i, 0)),   # q tile
            ],
        ),
        compiler_params=pltpu.CompilerParams(
            dimension_semantics=("parallel",),
            vmem_limit_bytes=vmem_limit,
        ),
        cost_estimate=cost,
    )(x_p, w1_c, b1_c, w2_c, b2_c, clusters_t, cc)

    return z_p[:N], q_p[:N, :k]


def dec_reference(x, w1, b1, w2, b2, clusters):
    """Pure-JAX reference matching the PyTorch forward (f32)."""
    h = jnp.maximum(x @ w1 + b1, 0.0)
    z = h @ w2 + b2
    dist = jnp.sum((z[:, None, :] - clusters[None, :, :]) ** 2, axis=2)
    q = 1.0 / (1.0 + dist)
    q = q ** 1.5
    q = q / jnp.sum(q, axis=1, keepdims=True)
    return z, q


if __name__ == "__main__":
    # Small shapes consistent with the module (batch of tile embeddings).
    # N is deliberately NOT a multiple of the tile to exercise the padded
    # tail, and N/tm > 1 so the parallel grid axis has multiple steps.
    N = 300
    input_dim = 256   # gigapath tile-embedding dim (1536 in prod; small here)
    latent_dim = 128  # 512 in the original module; small here
    n_clusters = 8

    key = jax.random.PRNGKey(0)
    kx, k1, k2, kc = jax.random.split(key, 4)

    x = jax.random.normal(kx, (N, input_dim), dtype=jnp.float32)

    # Deterministic parameter init (shapes follow the module's __init__).
    w1 = jax.random.normal(k1, (input_dim, latent_dim), jnp.float32) * (
        1.0 / jnp.sqrt(input_dim))
    b1 = jnp.zeros((1, latent_dim), jnp.float32)
    w2 = jax.random.normal(k2, (latent_dim, latent_dim), jnp.float32) * (
        1.0 / jnp.sqrt(latent_dim))
    b2 = jnp.zeros((1, latent_dim), jnp.float32)
    # xavier_normal_ for cluster_layer (n_clusters, latent_dim)
    xavier_std = jnp.sqrt(2.0 / (n_clusters + latent_dim))
    clusters = jax.random.normal(kc, (n_clusters, latent_dim), jnp.float32) * xavier_std

    try:
        z, q = jax.block_until_ready(
            dec_forward(x, w1, b1, w2, b2, clusters, tm=128))
    except Exception:
        # Fallback for JAX versions where pl.Buffered(1) is not accepted on a
        # pallas_call BlockSpec: rerun with default double-buffered constants.
        z, q = jax.block_until_ready(
            dec_forward(x, w1, b1, w2, b2, clusters, tm=128,
                        single_buffer_consts=False))

    z_ref, q_ref = dec_reference(x, w1, b1, w2, b2, clusters)
    assert z.shape == (N, latent_dim) and q.shape == (N, n_clusters)
    # bf16 MXU inputs with f32 accumulation -> relaxed tolerance
    # (use_bf16=False reproduces the f32 reference to ~1e-6).
    assert jnp.allclose(z, z_ref, atol=2e-2, rtol=2e-2), "z mismatch"
    assert jnp.allclose(q, q_ref, atol=2e-2, rtol=2e-2), "q mismatch"
    # Exact divide in the kernel -> rows sum to 1 at f32 precision.
    assert jnp.allclose(jnp.sum(q, axis=1), 1.0, atol=1e-4), "q rows not normalized"

    print("KERNEL_OK")
</pallas_src>

<mosaic_0001>
module attributes {stable_mosaic.version = 11 : i64} {
  func.func @_dec_kernel(%arg0: i32, %arg1: memref<128x256xbf16, #tpu.memory_space<vmem>>, %arg2: memref<256x128xbf16, #tpu.memory_space<vmem>>, %arg3: memref<1x128xf32, #tpu.memory_space<vmem>>, %arg4: memref<128x128xbf16, #tpu.memory_space<vmem>>, %arg5: memref<1x128xf32, #tpu.memory_space<vmem>>, %arg6: memref<128x128xbf16, #tpu.memory_space<vmem>>, %arg7: memref<1x128xf32, #tpu.memory_space<vmem>>, %arg8: memref<128x128xf32, #tpu.memory_space<vmem>>, %arg9: memref<128x128xf32, #tpu.memory_space<vmem>>) attributes {dimension_semantics = [#tpu.dimension_semantics<parallel>], iteration_bounds = array<i64: 3>, scalar_prefetch = 0 : i64, scratch_operands = 0 : i64, tpu.core_type = #tpu.core_type<tc>, window_params = [{transform_indices = @transform_0, window_bounds = array<i64: 128, 256>}, {pipeline_mode = #tpu.pipeline_mode<synchronous>, transform_indices = @transform_1, window_bounds = array<i64: 256, 128>}, {pipeline_mode = #tpu.pipeline_mode<synchronous>, transform_indices = @transform_2, window_bounds = array<i64: 1, 128>}, {pipeline_mode = #tpu.pipeline_mode<synchronous>, transform_indices = @transform_3, window_bounds = array<i64: 128, 128>}, {pipeline_mode = #tpu.pipeline_mode<synchronous>, transform_indices = @transform_4, window_bounds = array<i64: 1, 128>}, {pipeline_mode = #tpu.pipeline_mode<synchronous>, transform_indices = @transform_5, window_bounds = array<i64: 128, 128>}, {pipeline_mode = #tpu.pipeline_mode<synchronous>, transform_indices = @transform_6, window_bounds = array<i64: 1, 128>}, {transform_indices = @transform_7, window_bounds = array<i64: 128, 128>}, {transform_indices = @transform_8, window_bounds = array<i64: 128, 128>}]} {
    %c0 = arith.constant 0 : index
    %c0_0 = arith.constant 0 : index
    %0 = vector.load %arg1[%c0, %c0_0] : memref<128x256xbf16, #tpu.memory_space<vmem>>, vector<128x256xbf16>
    %c0_1 = arith.constant 0 : index
    %c0_2 = arith.constant 0 : index
    %1 = vector.load %arg2[%c0_1, %c0_2] : memref<256x128xbf16, #tpu.memory_space<vmem>>, vector<256x128xbf16>
    %cst = arith.constant dense<0.000000e+00> : vector<128x128xf32>
    %2 = tpu.matmul %0, %1, %cst {dimension_numbers = #tpu.dot_dimension_numbers<[1], [0], [0], [1], [0, 0, 1, 1], [], []>} : vector<128x256xbf16>, vector<256x128xbf16>, vector<128x128xf32> -> vector<128x128xf32>
    %c0_3 = arith.constant 0 : index
    %c0_4 = arith.constant 0 : index
    %3 = vector.load %arg3[%c0_3, %c0_4] : memref<1x128xf32, #tpu.memory_space<vmem>>, vector<1x128xf32>
    %4 = vector.broadcast %3 : vector<1x128xf32> to vector<128x128xf32>
    %5 = arith.addf %2, %4 : vector<128x128xf32>
    %cst_5 = arith.constant 0.000000e+00 : f32
    %6 = vector.broadcast %cst_5 : f32 to vector<128x128xf32>
    %7 = arith.maximumf %5, %6 : vector<128x128xf32>
    %8 = arith.truncf %7 : vector<128x128xf32> to vector<128x128xbf16>
    %c0_6 = arith.constant 0 : index
    %c0_7 = arith.constant 0 : index
    %9 = vector.load %arg4[%c0_6, %c0_7] : memref<128x128xbf16, #tpu.memory_space<vmem>>, vector<128x128xbf16>
    %cst_8 = arith.constant dense<0.000000e+00> : vector<128x128xf32>
    %10 = tpu.matmul %8, %9, %cst_8 {dimension_numbers = #tpu.dot_dimension_numbers<[1], [0], [0], [1], [0, 0, 1, 1], [], []>} : vector<128x128xbf16>, vector<128x128xbf16>, vector<128x128xf32> -> vector<128x128xf32>
    %c0_9 = arith.constant 0 : index
    %c0_10 = arith.constant 0 : index
    %11 = vector.load %arg5[%c0_9, %c0_10] : memref<1x128xf32, #tpu.memory_space<vmem>>, vector<1x128xf32>
    %12 = vector.broadcast %11 : vector<1x128xf32> to vector<128x128xf32>
    %13 = arith.addf %10, %12 : vector<128x128xf32>
    %c0_11 = arith.constant 0 : index
    %c0_12 = arith.constant 0 : index
    %14 = vector.load %arg8[%c0_11, %c0_12] : memref<128x128xf32, #tpu.memory_space<vmem>>, vector<128x128xf32>
    tpu.vector_store %arg8[%c0_11, %c0_12], %13 {strides = array<i32>} : memref<128x128xf32, #tpu.memory_space<vmem>>, vector<128x128xf32>,
    %15 = arith.truncf %13 : vector<128x128xf32> to vector<128x128xbf16>
    %c0_13 = arith.constant 0 : index
    %c0_14 = arith.constant 0 : index
    %16 = vector.load %arg6[%c0_13, %c0_14] : memref<128x128xbf16, #tpu.memory_space<vmem>>, vector<128x128xbf16>
    %cst_15 = arith.constant dense<0.000000e+00> : vector<128x128xf32>
    %17 = tpu.matmul %15, %16, %cst_15 {dimension_numbers = #tpu.dot_dimension_numbers<[1], [0], [0], [1], [0, 0, 1, 1], [], []>} : vector<128x128xbf16>, vector<128x128xbf16>, vector<128x128xf32> -> vector<128x128xf32>
    %18 = arith.mulf %13, %13 : vector<128x128xf32>
    %cst_16 = arith.constant dense<0.000000e+00> : vector<128xf32>
    %19 = vector.multi_reduction <add>, %18, %cst_16 [1] : vector<128x128xf32> to vector<128xf32>
    %20 = vector.shape_cast %19 : vector<128xf32> to vector<128x1xf32>
    %c0_17 = arith.constant 0 : index
    %c0_18 = arith.constant 0 : index
    %21 = vector.load %arg7[%c0_17, %c0_18] : memref<1x128xf32, #tpu.memory_space<vmem>>, vector<1x128xf32>
    %22 = vector.broadcast %20 : vector<128x1xf32> to vector<128x128xf32>
    %23 = vector.broadcast %21 : vector<1x128xf32> to vector<128x128xf32>
    %24 = arith.addf %22, %23 : vector<128x128xf32>
    %cst_19 = arith.constant 2.000000e+00 : f32
    %25 = vector.broadcast %cst_19 : f32 to vector<128x128xf32>
    %26 = arith.mulf %25, %17 : vector<128x128xf32>
    %27 = arith.subf %24, %26 : vector<128x128xf32>
    %cst_20 = arith.constant 0.000000e+00 : f32
    %28 = vector.broadcast %cst_20 : f32 to vector<128x128xf32>
    %29 = arith.maximumf %27, %28 : vector<128x128xf32>
    %cst_21 = arith.constant 1.000000e+00 : f32
    %30 = vector.broadcast %cst_21 : f32 to vector<128x128xf32>
    %31 = arith.addf %30, %29 : vector<128x128xf32>
    %32 = math.rsqrt %31 : vector<128x128xf32>
    %33 = arith.mulf %32, %32 : vector<128x128xf32>
    %34 = arith.mulf %33, %32 : vector<128x128xf32>
    %cst_22 = arith.constant dense<0.000000e+00> : vector<128xf32>
    %35 = vector.multi_reduction <add>, %34, %cst_22 [1] : vector<128x128xf32> to vector<128xf32>
    %36 = vector.shape_cast %35 : vector<128xf32> to vector<128x1xf32>
    %37 = vector.broadcast %36 : vector<128x1xf32> to vector<128x128xf32>
    %38 = arith.divf %34, %37 : vector<128x128xf32>
    %c0_23 = arith.constant 0 : index
    %c0_24 = arith.constant 0 : index
    %39 = vector.load %arg9[%c0_23, %c0_24] : memref<128x128xf32, #tpu.memory_space<vmem>>, vector<128x128xf32>
    tpu.vector_store %arg9[%c0_23, %c0_24], %38 {strides = array<i32>} : memref<128x128xf32, #tpu.memory_space<vmem>>, vector<128x128xf32>,
    return
  }
  func.func @transform_0(%arg0: i32) -> (i32, i32) {
    %c0_i32 = arith.constant 0 : i32
    %c0_i32_0 = arith.constant 0 : i32
    return %arg0, %c0_i32 : i32, i32
  }
  func.func @transform_1(%arg0: i32) -> (i32, i32) {
    %c0_i32 = arith.constant 0 : i32
    %c0_i32_0 = arith.constant 0 : i32
    %c0_i32_1 = arith.constant 0 : i32
    return %c0_i32, %c0_i32_0 : i32, i32
  }
  func.func @transform_2(%arg0: i32) -> (i32, i32) {
    %c0_i32 = arith.constant 0 : i32
    %c0_i32_0 = arith.constant 0 : i32
    %c0_i32_1 = arith.constant 0 : i32
    return %c0_i32, %c0_i32_0 : i32, i32
  }
  func.func @transform_3(%arg0: i32) -> (i32, i32) {
    %c0_i32 = arith.constant 0 : i32
    %c0_i32_0 = arith.constant 0 : i32
    %c0_i32_1 = arith.constant 0 : i32
    return %c0_i32, %c0_i32_0 : i32, i32
  }
  func.func @transform_4(%arg0: i32) -> (i32, i32) {
    %c0_i32 = arith.constant 0 : i32
    %c0_i32_0 = arith.constant 0 : i32
    %c0_i32_1 = arith.constant 0 : i32
    return %c0_i32, %c0_i32_0 : i32, i32
  }
  func.func @transform_5(%arg0: i32) -> (i32, i32) {
    %c0_i32 = arith.constant 0 : i32
    %c0_i32_0 = arith.constant 0 : i32
    %c0_i32_1 = arith.constant 0 : i32
    return %c0_i32, %c0_i32_0 : i32, i32
  }
  func.func @transform_6(%arg0: i32) -> (i32, i32) {
    %c0_i32 = arith.constant 0 : i32
    %c0_i32_0 = arith.constant 0 : i32
    %c0_i32_1 = arith.constant 0 : i32
    return %c0_i32, %c0_i32_0 : i32, i32
  }
  func.func @transform_7(%arg0: i32) -> (i32, i32) {
    %c0_i32 = arith.constant 0 : i32
    %c0_i32_0 = arith.constant 0 : i32
    return %arg0, %c0_i32 : i32, i32
  }
  func.func @transform_8(%arg0: i32) -> (i32, i32) {
    %c0_i32 = arith.constant 0 : i32
    %c0_i32_0 = arith.constant 0 : i32
    return %arg0, %c0_i32 : i32, i32
  }
}

module attributes {stable_mosaic.version = 11 : i64} {
  func.func @_dec_kernel(%arg0: i32, %arg1: memref<128x256xbf16, #tpu.memory_space<vmem>>, %arg2: memref<256x128xbf16, #tpu.memory_space<vmem>>, %arg3: memref<1x128xf32, #tpu.memory_space<vmem>>, %arg4: memref<128x128xbf16, #tpu.memory_space<vmem>>, %arg5: memref<1x128xf32, #tpu.memory_space<vmem>>, %arg6: memref<128x128xbf16, #tpu.memory_space<vmem>>, %arg7: memref<1x128xf32, #tpu.memory_space<vmem>>, %arg8: memref<128x128xf32, #tpu.memory_space<vmem>>, %arg9: memref<128x128xf32, #tpu.memory_space<vmem>>) attributes {dimension_semantics = [#tpu.dimension_semantics<parallel>], iteration_bounds = array<i64: 3>, scalar_prefetch = 0 : i64, scratch_operands = 0 : i64, tpu.core_type = #tpu.core_type<tc>, window_params = [{transform_indices = @transform_0, window_bounds = array<i64: 128, 256>}, {pipeline_mode = #tpu.pipeline_mode<synchronous>, transform_indices = @transform_1, window_bounds = array<i64: 256, 128>}, {pipeline_mode = #tpu.pipeline_mode<synchronous>, transform_indices = @transform_2, window_bounds = array<i64: 1, 128>}, {pipeline_mode = #tpu.pipeline_mode<synchronous>, transform_indices = @transform_3, window_bounds = array<i64: 128, 128>}, {pipeline_mode = #tpu.pipeline_mode<synchronous>, transform_indices = @transform_4, window_bounds = array<i64: 1, 128>}, {pipeline_mode = #tpu.pipeline_mode<synchronous>, transform_indices = @transform_5, window_bounds = array<i64: 128, 128>}, {pipeline_mode = #tpu.pipeline_mode<synchronous>, transform_indices = @transform_6, window_bounds = array<i64: 1, 128>}, {transform_indices = @transform_7, window_bounds = array<i64: 128, 128>}, {transform_indices = @transform_8, window_bounds = array<i64: 128, 128>}]} {
    %c0 = arith.constant 0 : index
    %c0_0 = arith.constant 0 : index
    %0 = vector.load %arg1[%c0, %c0_0] : memref<128x256xbf16, #tpu.memory_space<vmem>>, vector<128x256xbf16>
    %c0_1 = arith.constant 0 : index
    %c0_2 = arith.constant 0 : index
    %1 = vector.load %arg2[%c0_1, %c0_2] : memref<256x128xbf16, #tpu.memory_space<vmem>>, vector<256x128xbf16>
    %cst = arith.constant dense<0.000000e+00> : vector<128x128xf32>
    %2 = tpu.matmul %0, %1, %cst {dimension_numbers = #tpu.dot_dimension_numbers<[1], [0], [0], [1], [0, 0, 1, 1], [], []>} : vector<128x256xbf16>, vector<256x128xbf16>, vector<128x128xf32> -> vector<128x128xf32>
    %c0_3 = arith.constant 0 : index
    %c0_4 = arith.constant 0 : index
    %3 = vector.load %arg3[%c0_3, %c0_4] : memref<1x128xf32, #tpu.memory_space<vmem>>, vector<1x128xf32>
    %4 = vector.broadcast %3 : vector<1x128xf32> to vector<128x128xf32>
    %5 = arith.addf %2, %4 : vector<128x128xf32>
    %cst_5 = arith.constant 0.000000e+00 : f32
    %6 = vector.broadcast %cst_5 : f32 to vector<128x128xf32>
    %7 = arith.maximumf %5, %6 : vector<128x128xf32>
    %8 = arith.truncf %7 : vector<128x128xf32> to vector<128x128xbf16>
    %c0_6 = arith.constant 0 : index
    %c0_7 = arith.constant 0 : index
    %9 = vector.load %arg4[%c0_6, %c0_7] : memref<128x128xbf16, #tpu.memory_space<vmem>>, vector<128x128xbf16>
    %cst_8 = arith.constant dense<0.000000e+00> : vector<128x128xf32>
    %10 = tpu.matmul %8, %9, %cst_8 {dimension_numbers = #tpu.dot_dimension_numbers<[1], [0], [0], [1], [0, 0, 1, 1], [], []>} : vector<128x128xbf16>, vector<128x128xbf16>, vector<128x128xf32> -> vector<128x128xf32>
    %c0_9 = arith.constant 0 : index
    %c0_10 = arith.constant 0 : index
    %11 = vector.load %arg5[%c0_9, %c0_10] : memref<1x128xf32, #tpu.memory_space<vmem>>, vector<1x128xf32>
    %12 = vector.broadcast %11 : vector<1x128xf32> to vector<128x128xf32>
    %13 = arith.addf %10, %12 : vector<128x128xf32>
    %c0_11 = arith.constant 0 : index
    %c0_12 = arith.constant 0 : index
    %14 = vector.load %arg8[%c0_11, %c0_12] : memref<128x128xf32, #tpu.memory_space<vmem>>, vector<128x128xf32>
    tpu.vector_store %arg8[%c0_11, %c0_12], %13 {strides = array<i32>} : memref<128x128xf32, #tpu.memory_space<vmem>>, vector<128x128xf32>,
    %15 = arith.truncf %13 : vector<128x128xf32> to vector<128x128xbf16>
    %c0_13 = arith.constant 0 : index
    %c0_14 = arith.constant 0 : index
    %16 = vector.load %arg6[%c0_13, %c0_14] : memref<128x128xbf16, #tpu.memory_space<vmem>>, vector<128x128xbf16>
    %cst_15 = arith.constant dense<0.000000e+00> : vector<128x128xf32>
    %17 = tpu.matmul %15, %16, %cst_15 {dimension_numbers = #tpu.dot_dimension_numbers<[1], [0], [0], [1], [0, 0, 1, 1], [], []>} : vector<128x128xbf16>, vector<128x128xbf16>, vector<128x128xf32> -> vector<128x128xf32>
    %18 = arith.mulf %13, %13 : vector<128x128xf32>
    %cst_16 = arith.constant dense<0.000000e+00> : vector<128xf32>
    %19 = vector.multi_reduction <add>, %18, %cst_16 [1] : vector<128x128xf32> to vector<128xf32>
    %20 = vector.shape_cast %19 : vector<128xf32> to vector<128x1xf32>
    %c0_17 = arith.constant 0 : index
    %c0_18 = arith.constant 0 : index
    %21 = vector.load %arg7[%c0_17, %c0_18] : memref<1x128xf32, #tpu.memory_space<vmem>>, vector<1x128xf32>
    %22 = vector.broadcast %20 : vector<128x1xf32> to vector<128x128xf32>
    %23 = vector.broadcast %21 : vector<1x128xf32> to vector<128x128xf32>
    %24 = arith.addf %22, %23 : vector<128x128xf32>
    %cst_19 = arith.constant 2.000000e+00 : f32
    %25 = vector.broadcast %cst_19 : f32 to vector<128x128xf32>
    %26 = arith.mulf %25, %17 : vector<128x128xf32>
    %27 = arith.subf %24, %26 : vector<128x128xf32>
    %cst_20 = arith.constant 0.000000e+00 : f32
    %28 = vector.broadcast %cst_20 : f32 to vector<128x128xf32>
    %29 = arith.maximumf %27, %28 : vector<128x128xf32>
    %cst_21 = arith.constant 1.000000e+00 : f32
    %30 = vector.broadcast %cst_21 : f32 to vector<128x128xf32>
    %31 = arith.addf %30, %29 : vector<128x128xf32>
    %32 = math.rsqrt %31 : vector<128x128xf32>
    %33 = arith.mulf %32, %32 : vector<128x128xf32>
    %34 = arith.mulf %33, %32 : vector<128x128xf32>
    %cst_22 = arith.constant dense<0.000000e+00> : vector<128xf32>
    %35 = vector.multi_reduction <add>, %34, %cst_22 [1] : vector<128x128xf32> to vector<128xf32>
    %36 = vector.shape_cast %35 : vector<128xf32> to vector<128x1xf32>
    %37 = vector.broadcast %36 : vector<128x1xf32> to vector<128x128xf32>
    %38 = arith.divf %34, %37 : vector<128x128xf32>
    %c0_23 = arith.constant 0 : index
    %c0_24 = arith.constant 0 : index
    %39 = vector.load %arg9[%c0_23, %c0_24] : memref<128x128xf32, #tpu.memory_space<vmem>>, vector<128x128xf32>
    tpu.vector_store %arg9[%c0_23, %c0_24], %38 {strides = array<i32>} : memref<128x128xf32, #tpu.memory_space<vmem>>, vector<128x128xf32>,
    return
  }
  func.func @transform_0(%arg0: i32) -> (i32, i32) {
    %c0_i32 = arith.constant 0 : i32
    %c0_i32_0 = arith.constant 0 : i32
    return %arg0, %c0_i32 : i32, i32
  }
  func.func @transform_1(%arg0: i32) -> (i32, i32) {
    %c0_i32 = arith.constant 0 : i32
    %c0_i32_0 = arith.constant 0 : i32
    %c0_i32_1 = arith.constant 0 : i32
    return %c0_i32, %c0_i32_0 : i32, i32
  }
  func.func @transform_2(%arg0: i32) -> (i32, i32) {
    %c0_i32 = arith.constant 0 : i32
    %c0_i32_0 = arith.constant 0 : i32
    %c0_i32_1 = arith.constant 0 : i32
    return %c0_i32, %c0_i32_0 : i32, i32
  }
  func.func @transform_3(%arg0: i32) -> (i32, i32) {
    %c0_i32 = arith.constant 0 : i32
    %c0_i32_0 = arith.constant 0 : i32
    %c0_i32_1 = arith.constant 0 : i32
    return %c0_i32, %c0_i32_0 : i32, i32
  }
  func.func @transform_4(%arg0: i32) -> (i32, i32) {
    %c0_i32 = arith.constant 0 : i32
    %c0_i32_0 = arith.constant 0 : i32
    %c0_i32_1 = arith.constant 0 : i32
    return %c0_i32, %c0_i32_0 : i32, i32
  }
  func.func @transform_5(%arg0: i32) -> (i32, i32) {
    %c0_i32 = arith.constant 0 : i32
    %c0_i32_0 = arith.constant 0 : i32
    %c0_i32_1 = arith.constant 0 : i32
    return %c0_i32, %c0_i32_0 : i32, i32
  }
  func.func @transform_6(%arg0: i32) -> (i32, i32) {
    %c0_i32 = arith.constant 0 : i32
    %c0_i32_0 = arith.constant 0 : i32
    %c0_i32_1 = arith.constant 0 : i32
    return %c0_i32, %c0_i32_0 : i32, i32
  }
  func.func @transform_7(%arg0: i32) -> (i32, i32) {
    %c0_i32 = arith.constant 0 : i32
    %c0_i32_0 = arith.constant 0 : i32
    return %arg0, %c0_i32 : i32, i32
  }
  func.func @transform_8(%arg0: i32) -> (i32, i32) {
    %c0_i32 = arith.constant 0 : i32
    %c0_i32_0 = arith.constant 0 : i32
    return %arg0, %c0_i32 : i32, i32
  }
}

</mosaic_0001>

<bundles_post_ra>
// kernel: dec_forward.1
= control target key start
LH: loop header
LB: loop body
LE: loop exit
PB: predicated region body
PF: predicated region fallthrough
CT: control target
= control target key end

     0   :  { %s1792_s27 = smov 0   ;;  %s2094_s0 = inlined_call_operand.vmem [shape: bf16[384,256], index: 0, kind: input, shape index: {}]   ;;  %s2095_s1 = inlined_call_operand.vmem [shape: bf16[256,128], index: 1, kind: input, shape index: {}]   ;;  %s2096_s2 = inlined_call_operand.vmem [shape: f32[1,128], index: 2, kind: input, shape index: {}]   ;;  %s2097_s3 = inlined_call_operand.vmem [shape: bf16[128,128], index: 3, kind: input, shape index: {}]   ;;  %s2098_s4 = inlined_call_operand.vmem [shape: f32[1,128], index: 4, kind: input, shape index: {}]   ;;  %s2099_s5 = inlined_call_operand.vmem [shape: bf16[128,128], index: 5, kind: input, shape index: {}]   ;;  %s2100_s6 = inlined_call_operand.vmem [shape: f32[1,128], index: 6, kind: input, shape index: {}]   ;;  %s2101_s7 = inlined_call_operand.vmem [shape: f32[384,128], index: 7, kind: output, shape index: {0}]   ;;  %s2102_s8 = inlined_call_operand.vmem [shape: f32[384,128], index: 8, kind: output, shape index: {1}]  }
   0x1 LB: > { %s1385_s28 = sadd.s32 4294967295, %s1745_s27   ;;  %p1389_p0 = scmp.ge.s32.totalorder %s1745_s27, 1  ;;  %s1745_s27 = sphi %s1792_s27, %s19_s27  }
   0x2   : > { %p267_p1 = scmp.lt.s32.totalorder %s1745_s27, 4 }
   0x4   : > { %p268_p2 = pnand %p1389_p0, %p267_p1 }
   0x5   : > { %v1619_v0 = vld [vmem:[%s2095_s1 + $0x40] sm:$0xff] (!%p268_p2)   ;;  %s1390_s9 = sshll.u32 (!%p268_p2), %s1385_s28, 4  ;;  %v1621_v2 = vld [vmem:[%s2095_s1 + $0x48] sm:$0xff] (!%p268_p2)   ;;  %v1623_v4 = vld [vmem:[%s2095_s1 + $0x50] sm:$0xff] (!%p268_p2)  }
   0x6   : > { %271 = sbr.rel (%p268_p2) target bundleno = 935 (0x3a7), region = 48  ;;  %v1620_v1 = vld [vmem:[%s2095_s1] sm:$0xff] (!%p268_p2)   ;;  %1451 = vmatprep.subr.bf16.mxu0 (!%p268_p2), %v1619_v0  ;;  %v1622_v3 = vld [vmem:[%s2095_s1 + $0x8] sm:$0xff] (!%p268_p2)   ;;  %p308_p3 = scmp.lt.s32.totalorder (!%p268_p2), %s1390_s9, 47  ;;  %v1624_v5 = vld [vmem:[%s2095_s1 + $0x10] sm:$0xff] (!%p268_p2)  }
   0x7   : > { %1452 = vmatpush3.bf16.msra.mxu0 (!%p268_p2), %v1620_v1  ;;  %v1625_v6 = vld [vmem:[%s2095_s1 + $0x58] sm:$0xff] (!%p268_p2)   ;;  %v1627_v8 = vld [vmem:[%s2095_s1 + $0x60] sm:$0xff] (!%p268_p2)   ;;  %v1629_v10 = vld [vmem:[%s2095_s1 + $0x68] sm:$0xff] (!%p268_p2)  }
   0x8   : > { %1453 = vmatprep.subr.bf16.mxu0 (!%p268_p2), %v1621_v2  ;;  %v1626_v7 = vld [vmem:[%s2095_s1 + $0x18] sm:$0xff] (!%p268_p2)   ;;  %v1628_v9 = vld [vmem:[%s2095_s1 + $0x20] sm:$0xff] (!%p268_p2)   ;;  %v1630_v12 = vld [vmem:[%s2095_s1 + $0x28] sm:$0xff] (!%p268_p2)  }
   0x9   : > { %v1631_v13 = vld [vmem:[%s2095_s1 + $0x70] sm:$0xff] (!%p268_p2)   ;;  %v1633_v15 = vld [vmem:[%s2095_s1 + $0x78] sm:$0xff] (!%p268_p2)   ;;  %v1659_v17 = vld [vmem:[%s2097_s3] sm:$0xff] (!%p268_p2)  }
   0xa   : > { %v1632_v14 = vld [vmem:[%s2095_s1 + $0x30] sm:$0xff] (!%p268_p2)   ;;  %v1634_v16 = vld [vmem:[%s2095_s1 + $0x38] sm:$0xff] (!%p268_p2)   ;;  %v1660_v19 = vld [vmem:[%s2097_s3 + $0x8] sm:$0xff] (!%p268_p2)   ;;  %1547 = vmatprep.subr.bf16.mxu1 (!%p268_p2), %v1659_v17 }
   0xb   : > { %1454 = vmatpush3.bf16.msra.mxu0 (!%p268_p2), %v1622_v3  ;;  %v1661_v21 = vld [vmem:[%s2097_s3 + $0x10] sm:$0xff] (!%p268_p2)   ;;  %1548 = vmatpush3.bf16.msra.mxu1 (!%p268_p2), %v1659_v17  ;;  %v1662_v35 = vld [vmem:[%s2097_s3 + $0x18] sm:$0xff] (!%p268_p2)   ;;  %v1663_v36 = vld [vmem:[%s2097_s3 + $0x20] sm:$0xff] (!%p268_p2)  }
   0xc   : > { %1455 = vmatprep.subr.bf16.mxu0 (!%p268_p2), %v1623_v4  ;;  %1549 = vmatprep.subr.bf16.mxu1 (!%p268_p2), %v1660_v19  ;;  %v1664_v37 = vld [vmem:[%s2097_s3 + $0x28] sm:$0xff] (!%p268_p2)   ;;  %v1665_v38 = vld [vmem:[%s2097_s3 + $0x30] sm:$0xff] (!%p268_p2)   ;;  %v1666_v39 = vld [vmem:[%s2097_s3 + $0x38] sm:$0xff] (!%p268_p2)  }
   0xd   : > { %s2104_s9 = smov (!%p308_p3, %s1390_s9), 47  ;;  %v1667_v40 = vld [vmem:[%s2099_s5] sm:$0xff]   ;;  %v1668_v4 = vld [vmem:[%s2099_s5 + $0x8] sm:$0xff]   ;;  %v1670_v17 = vld [vmem:[%s2099_s5 + $0x18] sm:$0xff]  }
   0xe   : > { %s1824_s24 = sshll.u32 %s2104_s9, 3  ;;  %v1902_v43 = vld [vmem:[%s2096_s2] ss:$0 sm:$0xff] }
   0xf   : > { %1456 = vmatpush3.bf16.msra.mxu0 %v1624_v5  ;;  %s1833_s30 = scalar_lea.vmem %s2094_s0, %s1824_s24  ;;  %1550 = vmatpush3.bf16.msra.mxu1 %v1660_v19  ;;  %s1950_s21 = scalar_lea.vmem %s2101_s7, %s1824_s24 }
  0x10   : > { %1457 = vmatprep.subr.bf16.mxu0 %v1625_v6  ;;  %v1637_v11 = vld [vmem:[%s1833_s30 + $0x4] ss:$8 sps:$4 sm:$0xff]   ;;  %v1635_v18 = vld [vmem:[%s1833_s30] ss:$8 sps:$4 sm:$0xff]   ;;  %v1638_v20 = vld [vmem:[%s1833_s30 + $0x14] ss:$8 sps:$4 sm:$0xff]   ;;  %1551 = vmatprep.subr.bf16.mxu1 %v1661_v21  ;;  %s2057_s28 = scalar_lea.vmem %s2102_s8, %s1824_s24 }
  0x11   : > { %590 = vmatprep.mubr.bf16.mxu0 %v1637_v11  ;;  %v1640_v22 = vld [vmem:[%s1833_s30 + $0x10] ss:$8 sps:$4 sm:$0xff]   ;;  %v1641_v23 = vld [vmem:[%s1833_s30 + $0x24] ss:$8 sps:$4 sm:$0xff]   ;;  %v1643_v24 = vld [vmem:[%s1833_s30 + $0x20] ss:$8 sps:$4 sm:$0xff]  }
  0x12   : > { %v1644_v25 = vld [vmem:[%s1833_s30 + $0x34] ss:$8 sps:$4 sm:$0xff]   ;;  %v1646_v26 = vld [vmem:[%s1833_s30 + $0x30] ss:$8 sps:$4 sm:$0xff]   ;;  %v1647_v27 = vld [vmem:[%s1833_s30 + $0x44] ss:$8 sps:$4 sm:$0xff]  }
  0x13   : > { %1458 = vmatpush3.bf16.msra.mxu0 %v1626_v7  ;;  %1552 = vmatpush3.bf16.msra.mxu1 %v1661_v21  ;;  %v1649_v28 = vld [vmem:[%s1833_s30 + $0x40] ss:$8 sps:$4 sm:$0xff]   ;;  %v1650_v29 = vld [vmem:[%s1833_s30 + $0x54] ss:$8 sps:$4 sm:$0xff]   ;;  %v1652_v30 = vld [vmem:[%s1833_s30 + $0x50] ss:$8 sps:$4 sm:$0xff]  }
  0x14   : > { %1459 = vmatprep.subr.bf16.mxu0 %v1627_v8  ;;  %v1653_v31 = vld [vmem:[%s1833_s30 + $0x64] ss:$8 sps:$4 sm:$0xff]   ;;  %v1655_v32 = vld [vmem:[%s1833_s30 + $0x60] ss:$8 sps:$4 sm:$0xff]   ;;  %v1656_v33 = vld [vmem:[%s1833_s30 + $0x74] ss:$8 sps:$4 sm:$0xff]   ;;  %1553 = vmatprep.subr.bf16.mxu1 %v1662_v35 }
  0x15   : > { %v1658_v34 = vld [vmem:[%s1833_s30 + $0x70] ss:$8 sps:$4 sm:$0xff]  }
  0x17   : > { %1460 = vmatpush3.bf16.msra.mxu0 %v1628_v9  ;;  %1554 = vmatpush3.bf16.msra.mxu1 %v1662_v35  ;;  %v1669_v9 = vld [vmem:[%s2099_s5 + $0x10] sm:$0xff]  }
  0x18   : > { %1461 = vmatprep.subr.bf16.mxu0 %v1629_v10  ;;  %1555 = vmatprep.subr.bf16.mxu1 %v1663_v36 }
  0x1b   : > { %1462 = vmatpush3.bf16.msra.mxu0 %v1630_v12  ;;  %1556 = vmatpush3.bf16.msra.mxu1 %v1663_v36 }
  0x1c   : > { %1463 = vmatprep.subr.bf16.mxu0 %v1631_v13  ;;  %1557 = vmatprep.subr.bf16.mxu1 %v1664_v37 }
  0x1f   : > { %1464 = vmatpush3.bf16.msra.mxu0 %v1632_v14  ;;  %1558 = vmatpush3.bf16.msra.mxu1 %v1664_v37 }
  0x20   : > { %1465 = vmatprep.subr.bf16.mxu0 %v1633_v15  ;;  %1559 = vmatprep.subr.bf16.mxu1 %v1665_v38 }
  0x23   : > { %1466 = vmatpush3.bf16.msra.mxu0 %v1634_v16  ;;  %1560 = vmatpush3.bf16.msra.mxu1 %v1665_v38 }
  0x24   : > { %1561 = vmatprep.subr.bf16.mxu1 %v1666_v39 }
  0x26   : > { %591 = vmatmul.mubr.bf16.vlgmr.msra.gmra.mrb[0].mxu0 %v1635_v18 }
  0x27   : > { %598 = vmatprep.mubr.bf16.mxu0 %v1638_v20  ;;  %1562 = vmatpush3.bf16.msra.mxu1 %v1666_v39 }
  0x28   : > { %1579 = vmatprep.subr.bf16.mxu1 %v1667_v40 }
  0x2e   : > { %599 = vmatmul.mubr.bf16.gmra.mrb[4].mxu0 %v1640_v22  ;;  %v1671_v22 = vld [vmem:[%s2099_s5 + $0x20] sm:$0xff]  }
  0x2f   : > { %606 = vmatprep.mubr.bf16.mxu0 %v1641_v23 }
  0x36   : > { %607 = vmatmul.mubr.bf16.gmra.mrb[8].mxu0 %v1643_v24 }
  0x37   : > { %614 = vmatprep.mubr.bf16.mxu0 %v1644_v25 }
  0x3e   : > { %615 = vmatmul.mubr.bf16.gmra.mrb[12].mxu0 %v1646_v26 }
  0x3f   : > { %622 = vmatprep.mubr.bf16.mxu0 %v1647_v27 }
  0x46   : > { %623 = vmatmul.mubr.bf16.gmra.mrb[16].mxu0 %v1649_v28 }
  0x47   : > { %630 = vmatprep.mubr.bf16.mxu0 %v1650_v29 }
  0x4e   : > { %631 = vmatmul.mubr.bf16.gmra.mrb[20].mxu0 %v1652_v30  ;;  %v1672_v30 = vld [vmem:[%s2099_s5 + $0x28] sm:$0xff]  }
  0x4f   : > { %638 = vmatprep.mubr.bf16.mxu0 %v1653_v31 }
  0x56   : > { %639 = vmatmul.mubr.bf16.gmra.mrb[24].mxu0 %v1655_v32 }
  0x57   : > { %646 = vmatprep.mubr.bf16.mxu0 %v1656_v33 }
  0x5e   : > { %647 = vmatmul.mubr.bf16.gmra.mrb[28].mxu0 %v1658_v34 }
  0xf9   : > { %v1467_v41 = vpop.f32.mrb[0].mxu0 }
  0xfa   : > { %v1468_v42 = vpop.f32.mrb[1].mxu0 }
  0xfb   : > { %v1469_v44 = vadd.f32 %v1468_v42, %v1467_v41  ;;  %v1470_v45 = vpop.f32.mrb[2].mxu0 }
  0xfc   : > { %v1471_v46 = vpop.f32.mrb[3].mxu0 }
  0xfd   : > { %v1472_v47 = vadd.f32 %v1471_v46, %v1470_v45  ;;  %v593_v48 = vadd.f32 %v1469_v44, %v1902_v43 }
  0xff   : > { %v596_v49 = vadd.f32 %v1472_v47, %v1902_v43  ;;  %v655_v51 = vmax.f32 %v593_v48, 0.0 }
 0x101   : > { %v1473_v50 = vpop.f32.mrb[4].mxu0  ;;  %v656_v52 = vmax.f32 %v596_v49, 0.0 }
 0x102   : > { %v1474_v53 = vpop.f32.mrb[5].mxu0 }
 0x103   : > { %v1475_v54 = vadd.f32 %v1474_v53, %v1473_v50  ;;  %v1476_v55 = vpop.f32.mrb[6].mxu0  ;;  %v671_v56 = vpack.c.bf16 %v656_v52, %v655_v51 }
 0x104   : > { %v1477_v57 = vpop.f32.mrb[7].mxu0 }
 0x105   : > { %v601_v58 = vadd.f32 %v1475_v54, %v1902_v43  ;;  %v1478_v59 = vadd.f32 %v1477_v57, %v1476_v55  ;;  %1563 = vmatprep.mubr.bf16.mxu1 %v671_v56 }
 0x107   : > { %v604_v60 = vadd.f32 %v1478_v59, %v1902_v43  ;;  %v657_v61 = vmax.f32 %v601_v58, 0.0 }
 0x109   : > { %v658_v62 = vmax.f32 %v604_v60, 0.0  ;;  %v1479_v63 = vpop.f32.mrb[8].mxu0 }
 0x10a   : > { %v1480_v0 = vpop.f32.mrb[9].mxu0 }
 0x10b   : > { %v1481_v1 = vadd.f32 %v1480_v0, %v1479_v63  ;;  %v1482_v2 = vpop.f32.mrb[10].mxu0  ;;  %v672_v3 = vpack.c.bf16 %v658_v62, %v657_v61 }
 0x10c   : > { %v1483_v5 = vpop.f32.mrb[11].mxu0 }
 0x10d   : > { %v609_v6 = vadd.f32 %v1481_v1, %v1902_v43  ;;  %v1484_v7 = vadd.f32 %v1483_v5, %v1482_v2  ;;  %1564 = vmatmul.mubr.bf16.vlgmr.msra.gmra.mrb[0].mxu1 %v672_v3 }
 0x10e   : > { %1580 = vmatpush3.bf16.msra.mxu1 %v1667_v40 }
 0x10f   : > { %v612_v8 = vadd.f32 %v1484_v7, %v1902_v43  ;;  %1581 = vmatprep.subr.bf16.mxu1 %v1668_v4  ;;  %v659_v10 = vmax.f32 %v609_v6, 0.0 }
 0x111   : > { %v660_v11 = vmax.f32 %v612_v8, 0.0  ;;  %v1485_v12 = vpop.f32.mrb[12].mxu0  ;;  %v1673_v8 = vld [vmem:[%s2099_s5 + $0x30] sm:$0xff]  }
 0x112   : > { %v1486_v13 = vpop.f32.mrb[13].mxu0  ;;  %1582 = vmatpush3.bf16.msra.mxu1 %v1668_v4 }
 0x113   : > { %v1487_v14 = vadd.f32 %v1486_v13, %v1485_v12  ;;  %v1488_v15 = vpop.f32.mrb[14].mxu0  ;;  %v673_v16 = vpack.c.bf16 %v660_v11, %v659_v10  ;;  %1583 = vmatprep.subr.bf16.mxu1 %v1669_v9 }
 0x114   : > { %v1489_v18 = vpop.f32.mrb[15].mxu0 }
 0x115   : > { %v617_v19 = vadd.f32 %v1487_v14, %v1902_v43  ;;  %v1490_v20 = vadd.f32 %v1489_v18, %v1488_v15  ;;  %1567 = vmatprep.mubr.bf16.mxu1 %v673_v16 }
 0x116   : > { %1584 = vmatpush3.bf16.msra.mxu1 %v1669_v9  ;;  %v1674_v9 = vld [vmem:[%s2099_s5 + $0x38] sm:$0xff]  }
 0x117   : > { %v620_v21 = vadd.f32 %v1490_v20, %v1902_v43  ;;  %1585 = vmatprep.subr.bf16.mxu1 %v1670_v17  ;;  %v661_v23 = vmax.f32 %v617_v19, 0.0 }
 0x119   : > { %v662_v24 = vmax.f32 %v620_v21, 0.0  ;;  %v1491_v25 = vpop.f32.mrb[16].mxu0 }
 0x11a   : > { %v1492_v26 = vpop.f32.mrb[17].mxu0  ;;  %1586 = vmatpush3.bf16.msra.mxu1 %v1670_v17 }
 0x11b   : > { %v1493_v27 = vadd.f32 %v1492_v26, %v1491_v25  ;;  %v1494_v28 = vpop.f32.mrb[18].mxu0  ;;  %v674_v29 = vpack.c.bf16 %v662_v24, %v661_v23  ;;  %1587 = vmatprep.subr.bf16.mxu1 %v1671_v22 }
 0x11c   : > { %v1495_v31 = vpop.f32.mrb[19].mxu0 }
 0x11d   : > { %v625_v32 = vadd.f32 %v1493_v27, %v1902_v43  ;;  %v1496_v33 = vadd.f32 %v1495_v31, %v1494_v28  ;;  %1568 = vmatmul.mubr.bf16.gmra.mrb[4].mxu1 %v674_v29 }
 0x11e   : > { %1588 = vmatpush3.bf16.msra.mxu1 %v1671_v22 }
 0x11f   : > { %v628_v34 = vadd.f32 %v1496_v33, %v1902_v43  ;;  %1589 = vmatprep.subr.bf16.mxu1 %v1672_v30  ;;  %v663_v35 = vmax.f32 %v625_v32, 0.0 }
 0x121   : > { %v664_v36 = vmax.f32 %v628_v34, 0.0  ;;  %v1497_v37 = vpop.f32.mrb[20].mxu0 }
 0x122   : > { %v1498_v38 = vpop.f32.mrb[21].mxu0  ;;  %1590 = vmatpush3.bf16.msra.mxu1 %v1672_v30 }
 0x123   : > { %v1499_v39 = vadd.f32 %v1498_v38, %v1497_v37  ;;  %v1500_v40 = vpop.f32.mrb[22].mxu0  ;;  %v675_v41 = vpack.c.bf16 %v664_v36, %v663_v35  ;;  %1591 = vmatprep.subr.bf16.mxu1 %v1673_v8 }
 0x124   : > { %v1501_v42 = vpop.f32.mrb[23].mxu0 }
 0x125   : > { %v633_v44 = vadd.f32 %v1499_v39, %v1902_v43  ;;  %v1502_v45 = vadd.f32 %v1501_v42, %v1500_v40  ;;  %1571 = vmatprep.mubr.bf16.mxu1 %v675_v41 }
 0x126   : > { %1592 = vmatpush3.bf16.msra.mxu1 %v1673_v8 }
 0x127   : > { %v636_v46 = vadd.f32 %v1502_v45, %v1902_v43  ;;  %v665_v47 = vmax.f32 %v633_v44, 0.0  ;;  %1593 = vmatprep.subr.bf16.mxu1 %v1674_v9 }
 0x129   : > { %v666_v48 = vmax.f32 %v636_v46, 0.0  ;;  %v1503_v49 = vpop.f32.mrb[24].mxu0 }
 0x12a   : > { %v1504_v50 = vpop.f32.mrb[25].mxu0  ;;  %1594 = vmatpush3.bf16.msra.mxu1 %v1674_v9 }
 0x12b   : > { %v1505_v51 = vadd.f32 %v1504_v50, %v1503_v49  ;;  %v1506_v52 = vpop.f32.mrb[26].mxu0  ;;  %v676_v53 = vpack.c.bf16 %v666_v48, %v665_v47 }
 0x12c   : > { %v1507_v54 = vpop.f32.mrb[27].mxu0 }
 0x12d   : > { %v641_v55 = vadd.f32 %v1505_v51, %v1902_v43  ;;  %v1508_v56 = vadd.f32 %v1507_v54, %v1506_v52  ;;  %1572 = vmatmul.mubr.bf16.gmra.mrb[8].mxu1 %v676_v53 }
 0x12f   : > { %v644_v57 = vadd.f32 %v1508_v56, %v1902_v43  ;;  %v667_v58 = vmax.f32 %v641_v55, 0.0 }
 0x131   : > { %v668_v59 = vmax.f32 %v644_v57, 0.0  ;;  %v1509_v60 = vpop.f32.mrb[28].mxu0 }
 0x132   : > { %v1510_v61 = vpop.f32.mrb[29].mxu0 }
 0x133   : > { %v1511_v62 = vadd.f32 %v1510_v61, %v1509_v60  ;;  %v1512_v63 = vpop.f32.mrb[30].mxu0  ;;  %v677_v0 = vpack.c.bf16 %v668_v59, %v667_v58 }
 0x134   : > { %v1513_v1 = vpop.f32.mrb[31].mxu0 }
 0x135   : > { %v649_v2 = vadd.f32 %v1511_v62, %v1902_v43  ;;  %v1514_v3 = vadd.f32 %v1513_v1, %v1512_v63  ;;  %1575 = vmatprep.mubr.bf16.mxu1 %v677_v0 }
 0x137   : > { %v652_v4 = vadd.f32 %v1514_v3, %v1902_v43  ;;  %v669_v5 = vmax.f32 %v649_v2, 0.0  ;;  %v1944_v43 = vld [vmem:[%s2098_s4] ss:$0 sm:$0xff] }
 0x139   : > { %v670_v6 = vmax.f32 %v652_v4, 0.0 }
 0x13b   : > { %v678_v7 = vpack.c.bf16 %v670_v6, %v669_v5  ;;  %v1987_v5 = vld [vmem:[%s2100_s6] ss:$0 sm:$0xff] }
 0x13d   : > { %1576 = vmatmul.mubr.bf16.gmra.mrb[12].mxu1 %v678_v7 }
 0x1e0   : > { %v1565_v10 = vpop.f32.mrb[0].mxu1 }
 0x1e1   : > { %v793_v11 = vadd.f32 %v1565_v10, %v1944_v43  ;;  %v784_v12 = vpop.f32.mrb[1].mxu1 }
 0x1e2   : > { %v785_v13 = vadd.f32 %v1944_v43, %v784_v12  ;;  %v1566_v14 = vpop.f32.mrb[2].mxu1 }
 0x1e3   : > { %849 = vst [vmem:[%s1950_s21 + $0x10] sm:$0xff] %v793_v11  ;;  %v796_v15 = vadd.f32 %v1566_v14, %v1944_v43  ;;  %v787_v16 = vpop.f32.mrb[3].mxu1  ;;  %v1034_v17 = vmul.f32 %v793_v11, %v793_v11 }
 0x1e4   : > { %847 = vst [vmem:[%s1950_s21] sm:$0xff] %v785_v13  ;;  %v788_v18 = vadd.f32 %v1944_v43, %v787_v16  ;;  %v1032_v19 = vmul.f32 %v785_v13, %v785_v13 }
 0x1e5   : > { %850 = vst [vmem:[%s1950_s21 + $0x18] sm:$0xff] %v796_v15  ;;  %v864_v20 = vpack.c.bf16 %v796_v15, %v793_v11  ;;  %1052 = vadd.xlane.f32.xlu1 %v1034_v17  ;;  %v1035_v22 = vmul.f32 %v796_v15, %v796_v15 }
 0x1e6   : > { %848 = vst [vmem:[%s1950_s21 + $0x8] sm:$0xff] %v788_v18  ;;  %1048 = vadd.xlane.f32.xlu0 %v1032_v19  ;;  %v863_v21 = vpack.c.bf16 %v788_v18, %v785_v13  ;;  %v1033_v23 = vmul.f32 %v788_v18, %v788_v18 }
 0x1e8   : > { %1595 = vmatprep.mubr.bf16.mxu1 %v863_v21 }
 0x1e9   : > { %1054 = vadd.xlane.f32.xlu1 %v1035_v22  ;;  %1596 = vmatmul.mubr.bf16.vlgmr.msra.gmra.mrb[16].mxu1 %v864_v20 }
 0x1ea   : > { %1050 = vadd.xlane.f32.xlu0 %v1033_v23 }
 0x1f0   : > { %v1569_v24 = vpop.f32.mrb[4].mxu1 }
 0x1f1   : > { %v809_v25 = vadd.f32 %v1569_v24, %v1944_v43  ;;  %v800_v26 = vpop.f32.mrb[5].mxu1 }
 0x1f2   : > { %v801_v27 = vadd.f32 %v1944_v43, %v800_v26  ;;  %v1570_v28 = vpop.f32.mrb[6].mxu1 }
 0x1f3   : > { %853 = vst [vmem:[%s1950_s21 + $0x30] sm:$0xff] %v809_v25  ;;  %v812_v29 = vadd.f32 %v1570_v28, %v1944_v43  ;;  %v803_v30 = vpop.f32.mrb[7].mxu1  ;;  %v1038_v31 = vmul.f32 %v809_v25, %v809_v25 }
 0x1f4   : > { %851 = vst [vmem:[%s1950_s21 + $0x20] sm:$0xff] %v801_v27  ;;  %v804_v32 = vadd.f32 %v1944_v43, %v803_v30  ;;  %v1036_v36 = vmul.f32 %v801_v27, %v801_v27 }
 0x1f5   : > { %854 = vst [vmem:[%s1950_s21 + $0x38] sm:$0xff] %v812_v29  ;;  %1060 = vadd.xlane.f32.xlu0 %v1038_v31  ;;  %v1039_v33 = vmul.f32 %v812_v29, %v812_v29  ;;  %v866_v34 = vpack.c.bf16 %v812_v29, %v809_v25 }
 0x1f6   : > { %852 = vst [vmem:[%s1950_s21 + $0x28] sm:$0xff] %v804_v32  ;;  %v865_v35 = vpack.c.bf16 %v804_v32, %v801_v27  ;;  %v1037_v37 = vmul.f32 %v804_v32, %v804_v32 }
 0x1f7   : > { %1062 = vadd.xlane.f32.xlu1 %v1039_v33 }
 0x1f8   : > { %1599 = vmatprep.mubr.bf16.mxu1 %v865_v35 }
 0x1f9   : > { %1056 = vadd.xlane.f32.xlu0 %v1036_v36  ;;  %1600 = vmatmul.mubr.bf16.gmra.mrb[20].mxu1 %v866_v34 }
 0x1fb   : > { %1058 = vadd.xlane.f32.xlu1 %v1037_v37 }
 0x200   : > { %v1573_v38 = vpop.f32.mrb[8].mxu1 }
 0x201   : > { %v825_v39 = vadd.f32 %v1573_v38, %v1944_v43  ;;  %v816_v40 = vpop.f32.mrb[9].mxu1 }
 0x202   : > { %v817_v41 = vadd.f32 %v1944_v43, %v816_v40  ;;  %v1574_v42 = vpop.f32.mrb[10].mxu1 }
 0x203   : > { %857 = vst [vmem:[%s1950_s21 + $0x50] sm:$0xff] %v825_v39  ;;  %v828_v44 = vadd.f32 %v1574_v42, %v1944_v43  ;;  %v819_v45 = vpop.f32.mrb[11].mxu1  ;;  %v1042_v46 = vmul.f32 %v825_v39, %v825_v39 }
 0x204   : > { %855 = vst [vmem:[%s1950_s21 + $0x40] sm:$0xff] %v817_v41  ;;  %v820_v47 = vadd.f32 %v1944_v43, %v819_v45  ;;  %v1040_v51 = vmul.f32 %v817_v41, %v817_v41 }
 0x205   : > { %858 = vst [vmem:[%s1950_s21 + $0x58] sm:$0xff] %v828_v44  ;;  %1068 = vadd.xlane.f32.xlu0 %v1042_v46  ;;  %v1043_v48 = vmul.f32 %v828_v44, %v828_v44  ;;  %v868_v49 = vpack.c.bf16 %v828_v44, %v825_v39 }
 0x206   : > { %856 = vst [vmem:[%s1950_s21 + $0x48] sm:$0xff] %v820_v47  ;;  %v867_v50 = vpack.c.bf16 %v820_v47, %v817_v41  ;;  %v1041_v52 = vmul.f32 %v820_v47, %v820_v47 }
 0x207   : > { %1070 = vadd.xlane.f32.xlu1 %v1043_v48 }
 0x208   : > { %1603 = vmatprep.mubr.bf16.mxu1 %v867_v50 }
 0x209   : > { %1064 = vadd.xlane.f32.xlu0 %v1040_v51  ;;  %1604 = vmatmul.mubr.bf16.gmra.mrb[24].mxu1 %v868_v49 }
 0x20b   : > { %1066 = vadd.xlane.f32.xlu1 %v1041_v52 }
 0x210   : > { %v1577_v53 = vpop.f32.mrb[12].mxu1 }
 0x211   : > { %v841_v54 = vadd.f32 %v1577_v53, %v1944_v43  ;;  %v832_v55 = vpop.f32.mrb[13].mxu1 }
 0x212   : > { %v833_v56 = vadd.f32 %v1944_v43, %v832_v55  ;;  %v1578_v57 = vpop.f32.mrb[14].mxu1 }
 0x213   : > { %861 = vst [vmem:[%s1950_s21 + $0x70] sm:$0xff] %v841_v54  ;;  %v844_v58 = vadd.f32 %v1578_v57, %v1944_v43  ;;  %v835_v59 = vpop.f32.mrb[15].mxu1  ;;  %v1046_v1 = vmul.f32 %v841_v54, %v841_v54 }
 0x214   : > { %859 = vst [vmem:[%s1950_s21 + $0x60] sm:$0xff] %v833_v56  ;;  %v836_v60 = vadd.f32 %v1944_v43, %v835_v59  ;;  %v1044_v61 = vmul.f32 %v833_v56, %v833_v56 }
 0x215   : > { %862 = vst [vmem:[%s1950_s21 + $0x78] sm:$0xff] %v844_v58  ;;  %v870_v62 = vpack.c.bf16 %v844_v58, %v841_v54  ;;  %v1047_v2 = vmul.f32 %v844_v58, %v844_v58 }
 0x216   : > { %860 = vst [vmem:[%s1950_s21 + $0x68] sm:$0xff] %v836_v60  ;;  %1072 = vadd.xlane.f32.xlu0 %v1044_v61  ;;  %v1045_v63 = vmul.f32 %v836_v60, %v836_v60  ;;  %v869_v0 = vpack.c.bf16 %v836_v60, %v833_v56 }
 0x218   : > { %1074 = vadd.xlane.f32.xlu1 %v1045_v63  ;;  %1607 = vmatprep.mubr.bf16.mxu1 %v869_v0 }
 0x219   : > { %1608 = vmatmul.mubr.bf16.gmra.mrb[28].mxu1 %v870_v62 }
 0x21a   : > { %1076 = vadd.xlane.f32.xlu0 %v1046_v1 }
 0x21c   : > { %1078 = vadd.xlane.f32.xlu1 %v1047_v2 }
 0x272   : > { %v1053_v3 = vpop.xlane.xlu1 %1052 }
 0x273   : > { %v1049_v4 = vpop.xlane.xlu0 %1048  ;;  %v1089_v8 = vadd.f32 %v1987_v5, %v1053_v3 }
 0x274   : > { %v1087_v11 = vadd.f32 %v1987_v5, %v1049_v4 }
 0x276   : > { %v1055_v6 = vpop.xlane.xlu1 %1054 }
 0x277   : > { %v1051_v9 = vpop.xlane.xlu0 %1050  ;;  %v1090_v14 = vadd.f32 %v1987_v5, %v1055_v6 }
 0x278   : > { %v1088_v18 = vadd.f32 %v1987_v5, %v1051_v9 }
 0x282   : > { %v1061_v29 = vpop.xlane.xlu0 %1060 }
 0x283   : > { %v1093_v35 = vadd.f32 %v1987_v5, %v1061_v29 }
 0x284   : > { %v1063_v32 = vpop.xlane.xlu1 %1062 }
 0x285   : > { %v1094_v44 = vadd.f32 %v1987_v5, %v1063_v32 }
 0x286   : > { %v1057_v33 = vpop.xlane.xlu0 %1056 }
 0x287   : > { %v1091_v39 = vadd.f32 %v1987_v5, %v1057_v33 }
 0x288   : > { %v1059_v36 = vpop.xlane.xlu1 %1058 }
 0x289   : > { %v1092_v49 = vadd.f32 %v1987_v5, %v1059_v36 }
 0x292   : > { %v1069_v4 = vpop.xlane.xlu0 %1068 }
 0x294   : > { %v1071_v9 = vpop.xlane.xlu1 %1070 }
 0x2bc   : > { %v1597_v7 = vpop.f32.mrb[16].mxu1 }
 0x2bd   : > { %v1105_v43 = vmul.f32 2.0, %v1597_v7  ;;  %v969_v10 = vpop.f32.mrb[17].mxu1 }
 0x2be   : > { %v1103_v12 = vmul.f32 2.0, %v969_v10  ;;  %v1598_v13 = vpop.f32.mrb[18].mxu1  ;;  %v1065_v10 = vpop.xlane.xlu0 %1064 }
 0x2bf   : > { %v1121_v15 = vsub.f32 %v1089_v8, %v1105_v43  ;;  %v1106_v16 = vmul.f32 2.0, %v1598_v13  ;;  %v972_v17 = vpop.f32.mrb[19].mxu1  ;;  %v1067_v13 = vpop.xlane.xlu1 %1066 }
 0x2c0   : > { %v1119_v19 = vsub.f32 %v1087_v11, %v1103_v12  ;;  %v1104_v20 = vmul.f32 2.0, %v972_v17  ;;  %v1097_v12 = vadd.f32 %v1987_v5, %v1069_v4 }
 0x2c1   : > { %v1137_v21 = vmax.f32 %v1121_v15, 0.0  ;;  %v1122_v22 = vsub.f32 %v1090_v14, %v1106_v16  ;;  %v1095_v16 = vadd.f32 %v1987_v5, %v1065_v10 }
 0x2c2   : > { %v1135_v23 = vmax.f32 %v1119_v19, 0.0  ;;  %v1120_v24 = vsub.f32 %v1088_v18, %v1104_v20  ;;  %v1098_v20 = vadd.f32 %v1987_v5, %v1071_v9 }
 0x2c3   : > { %v1153_v25 = vadd.f32 1.0, %v1137_v21  ;;  %v1138_v26 = vmax.f32 %v1122_v22, 0.0 }
 0x2c4   : > { %v1151_v27 = vadd.f32 1.0, %v1135_v23  ;;  %v1136_v28 = vmax.f32 %v1120_v24, 0.0 }
 0x2c5   : > { %1675 = vrsqrt.f32 %v1153_v25  ;;  %v1154_v30 = vadd.f32 1.0, %v1138_v26  ;;  %v1096_v25 = vadd.f32 %v1987_v5, %v1067_v13 }
 0x2c6   : > { %1677 = vrsqrt.f32 %v1151_v27  ;;  %v1152_v31 = vadd.f32 1.0, %v1136_v28 }
 0x2c7   : > { %1679 = vrsqrt.f32 %v1154_v30 }
 0x2c8   : > { %1681 = vrsqrt.f32 %v1152_v31 }
 0x2cc   : > { %v1601_v34 = vpop.f32.mrb[20].mxu1 }
 0x2cd   : > { %v1109_v37 = vmul.f32 2.0, %v1601_v34  ;;  %v985_v38 = vpop.f32.mrb[21].mxu1 }
 0x2ce   : > { %v1107_v40 = vmul.f32 2.0, %v985_v38  ;;  %v1602_v41 = vpop.f32.mrb[22].mxu1 }
 0x2cf   : > { %v1676_v42 = vpop.eup %1675  ;;  %v1125_v45 = vsub.f32 %v1093_v35, %v1109_v37  ;;  %v1110_v46 = vmul.f32 2.0, %v1602_v41  ;;  %v988_v47 = vpop.f32.mrb[23].mxu1 }
 0x2d0   : > { %v1678_v48 = vpop.eup %1677  ;;  %v1123_v50 = vsub.f32 %v1091_v39, %v1107_v40  ;;  %v1108_v51 = vmul.f32 2.0, %v988_v47  ;;  %v1185_v52 = vmul.f32 %v1676_v42, %v1676_v42  ;;  %v1073_v40 = vpop.xlane.xlu0 %1072 }
 0x2d1   : > { %v1680_v53 = vpop.eup %1679  ;;  %v1141_v54 = vmax.f32 %v1125_v45, 0.0  ;;  %v1126_v55 = vsub.f32 %v1094_v44, %v1110_v46  ;;  %v1183_v56 = vmul.f32 %v1678_v48, %v1678_v48  ;;  %v1075_v47 = vpop.xlane.xlu1 %1074 }
 0x2d2   : > { %v1682_v57 = vpop.eup %1681  ;;  %v1139_v58 = vmax.f32 %v1123_v50, 0.0  ;;  %v1124_v59 = vsub.f32 %v1092_v49, %v1108_v51  ;;  %v1997_v60 = vmul.f32 %v1676_v42, %v1185_v52  ;;  %v1186_v61 = vmul.f32 %v1680_v53, %v1680_v53 }
 0x2d3   : > { %v1157_v62 = vadd.f32 1.0, %v1141_v54  ;;  %v1142_v63 = vmax.f32 %v1126_v55, 0.0  ;;  %v1184_v3 = vmul.f32 %v1682_v57, %v1682_v57  ;;  %v2003_v8 = vmul.f32 %v1678_v48, %v1183_v56 }
 0x2d4   : > { %v1155_v0 = vadd.f32 1.0, %v1139_v58  ;;  %v1140_v1 = vmax.f32 %v1124_v59, 0.0  ;;  %1219 = vadd.xlane.f32.xlu0 %v1997_v60  ;;  %v2000_v2 = vmul.f32 %v1680_v53, %v1186_v61  ;;  %v1077_v51 = vpop.xlane.xlu0 %1076  ;;  %v1100_v4 = vadd.f32 %v1987_v5, %v1075_v47 }
 0x2d5   : > { %1683 = vrsqrt.f32 %v1157_v62  ;;  %v1158_v6 = vadd.f32 1.0, %v1142_v63  ;;  %v2006_v43 = vmul.f32 %v1682_v57, %v1184_v3  ;;  %v1079_v52 = vpop.xlane.xlu1 %1078  ;;  %v1101_v54 = vadd.f32 %v1987_v5, %v1077_v51 }
 0x2d6   : > { %1685 = vrsqrt.f32 %v1155_v0  ;;  %v1156_v7 = vadd.f32 1.0, %v1140_v1  ;;  %1221 = vadd.xlane.f32.xlu1 %v2000_v2  ;;  %v1099_v57 = vadd.f32 %v1987_v5, %v1073_v40  ;;  %v1102_v62 = vadd.f32 %v1987_v5, %v1079_v52 }
 0x2d7   : > { %1687 = vrsqrt.f32 %v1158_v6 }
 0x2d8   : > { %1689 = vrsqrt.f32 %v1156_v7  ;;  %1215 = vadd.xlane.f32.xlu0 %v2003_v8 }
 0x2da   : > { %1217 = vadd.xlane.f32.xlu1 %v2006_v43 }
 0x2dc   : > { %v1605_v11 = vpop.f32.mrb[24].mxu1 }
 0x2dd   : > { %v1113_v14 = vmul.f32 2.0, %v1605_v11  ;;  %v1001_v15 = vpop.f32.mrb[25].mxu1 }
 0x2de   : > { %v1111_v17 = vmul.f32 2.0, %v1001_v15  ;;  %v1606_v18 = vpop.f32.mrb[26].mxu1 }
 0x2df   : > { %v1684_v19 = vpop.eup %1683  ;;  %v1129_v21 = vsub.f32 %v1097_v12, %v1113_v14  ;;  %v1114_v22 = vmul.f32 2.0, %v1606_v18  ;;  %v1004_v23 = vpop.f32.mrb[27].mxu1 }
 0x2e0   : > { %v1686_v24 = vpop.eup %1685  ;;  %v1127_v26 = vsub.f32 %v1095_v16, %v1111_v17  ;;  %v1112_v27 = vmul.f32 2.0, %v1004_v23  ;;  %v1189_v28 = vmul.f32 %v1684_v19, %v1684_v19 }
 0x2e1   : > { %v1688_v29 = vpop.eup %1687  ;;  %v1145_v30 = vmax.f32 %v1129_v21, 0.0  ;;  %v1130_v31 = vsub.f32 %v1098_v20, %v1114_v22  ;;  %v1187_v32 = vmul.f32 %v1686_v24, %v1686_v24 }
 0x2e2   : > { %v1690_v33 = vpop.eup %1689  ;;  %v1143_v34 = vmax.f32 %v1127_v26, 0.0  ;;  %v1128_v35 = vsub.f32 %v1096_v25, %v1112_v27  ;;  %v2013_v36 = vmul.f32 %v1684_v19, %v1189_v28  ;;  %v1190_v37 = vmul.f32 %v1688_v29, %v1688_v29 }
 0x2e3   : > { %v1161_v38 = vadd.f32 1.0, %v1145_v30  ;;  %v1146_v39 = vmax.f32 %v1130_v31, 0.0  ;;  %v1188_v45 = vmul.f32 %v1690_v33, %v1690_v33  ;;  %v2019_v49 = vmul.f32 %v1686_v24, %v1187_v32 }
 0x2e4   : > { %v1159_v41 = vadd.f32 1.0, %v1143_v34  ;;  %v1144_v42 = vmax.f32 %v1128_v35, 0.0  ;;  %1227 = vadd.xlane.f32.xlu0 %v2013_v36  ;;  %v2016_v44 = vmul.f32 %v1688_v29, %v1190_v37 }
 0x2e5   : > { %1691 = vrsqrt.f32 %v1161_v38  ;;  %v1162_v46 = vadd.f32 1.0, %v1146_v39  ;;  %v2022_v50 = vmul.f32 %v1690_v33, %v1188_v45 }
 0x2e6   : > { %1693 = vrsqrt.f32 %v1159_v41  ;;  %v1160_v48 = vadd.f32 1.0, %v1144_v42  ;;  %1229 = vadd.xlane.f32.xlu1 %v2016_v44 }
 0x2e7   : > { %1695 = vrsqrt.f32 %v1162_v46 }
 0x2e8   : > { %1697 = vrsqrt.f32 %v1160_v48  ;;  %1223 = vadd.xlane.f32.xlu0 %v2019_v49 }
 0x2ea   : > { %1225 = vadd.xlane.f32.xlu1 %v2022_v50 }
 0x2ec   : > { %v1609_v53 = vpop.f32.mrb[28].mxu1 }
 0x2ed   : > { %v1117_v55 = vmul.f32 2.0, %v1609_v53  ;;  %v1017_v56 = vpop.f32.mrb[29].mxu1 }
 0x2ee   : > { %v1115_v58 = vmul.f32 2.0, %v1017_v56  ;;  %v1610_v59 = vpop.f32.mrb[30].mxu1 }
 0x2ef   : > { %v1692_v61 = vpop.eup %1691  ;;  %v1133_v63 = vsub.f32 %v1101_v54, %v1117_v55  ;;  %v1118_v0 = vmul.f32 2.0, %v1610_v59  ;;  %v1020_v1 = vpop.f32.mrb[31].mxu1 }
 0x2f0   : > { %v1694_v3 = vpop.eup %1693  ;;  %v1131_v6 = vsub.f32 %v1099_v57, %v1115_v58  ;;  %v1116_v7 = vmul.f32 2.0, %v1020_v1  ;;  %v1193_v9 = vmul.f32 %v1692_v61, %v1692_v61 }
 0x2f1   : > { %v1696_v10 = vpop.eup %1695  ;;  %v1149_v11 = vmax.f32 %v1133_v63, 0.0  ;;  %v1134_v12 = vsub.f32 %v1102_v62, %v1118_v0  ;;  %v1191_v13 = vmul.f32 %v1694_v3, %v1694_v3 }
 0x2f2   : > { %v1698_v14 = vpop.eup %1697  ;;  %v1147_v15 = vmax.f32 %v1131_v6, 0.0  ;;  %v1132_v16 = vsub.f32 %v1100_v4, %v1116_v7  ;;  %v2029_v17 = vmul.f32 %v1692_v61, %v1193_v9  ;;  %v1194_v18 = vmul.f32 %v1696_v10, %v1696_v10 }
 0x2f3   : > { %v1165_v19 = vadd.f32 1.0, %v1149_v11  ;;  %v1150_v20 = vmax.f32 %v1134_v12, 0.0  ;;  %v1192_v23 = vmul.f32 %v1698_v14, %v1698_v14  ;;  %v2035_v26 = vmul.f32 %v1694_v3, %v1191_v13 }
 0x2f4   : > { %v1163_v21 = vadd.f32 1.0, %v1147_v15  ;;  %v1148_v22 = vmax.f32 %v1132_v16, 0.0  ;;  %1235 = vadd.xlane.f32.xlu0 %v2029_v17  ;;  %v2032_v5 = vmul.f32 %v1696_v10, %v1194_v18 }
 0x2f5   : > { %1699 = vrsqrt.f32 %v1165_v19  ;;  %v1166_v24 = vadd.f32 1.0, %v1150_v20  ;;  %v2038_v27 = vmul.f32 %v1698_v14, %v1192_v23 }
 0x2f6   : > { %1701 = vrsqrt.f32 %v1163_v21  ;;  %v1164_v25 = vadd.f32 1.0, %v1148_v22  ;;  %1237 = vadd.xlane.f32.xlu1 %v2032_v5 }
 0x2f7   : > { %1703 = vrsqrt.f32 %v1166_v24 }
 0x2f8   : > { %1705 = vrsqrt.f32 %v1164_v25  ;;  %1231 = vadd.xlane.f32.xlu0 %v2035_v26 }
 0x2fa   : > { %1233 = vadd.xlane.f32.xlu1 %v2038_v27 }
 0x2ff   : > { %v1700_v28 = vpop.eup %1699 }
 0x300   : > { %v1702_v29 = vpop.eup %1701  ;;  %v1197_v35 = vmul.f32 %v1700_v28, %v1700_v28 }
 0x301   : > { %v1704_v30 = vpop.eup %1703  ;;  %v1195_v31 = vmul.f32 %v1702_v29, %v1702_v29 }
 0x302   : > { %v1706_v32 = vpop.eup %1705  ;;  %v1198_v38 = vmul.f32 %v1704_v30, %v1704_v30  ;;  %v2047_v39 = vmul.f32 %v1700_v28, %v1197_v35 }
 0x303   : > { %v2041_v33 = vmul.f32 %v1702_v29, %v1195_v31  ;;  %v1196_v34 = vmul.f32 %v1706_v32, %v1706_v32 }
 0x304   : > { %v2050_v40 = vmul.f32 %v1704_v30, %v1198_v38 }
 0x305   : > { %1239 = vadd.xlane.f32.xlu0 %v2041_v33  ;;  %v2044_v37 = vmul.f32 %v1706_v32, %v1196_v34 }
 0x307   : > { %1241 = vadd.xlane.f32.xlu1 %v2044_v37 }
 0x309   : > { %1243 = vadd.xlane.f32.xlu0 %v2047_v39 }
 0x30b   : > { %1245 = vadd.xlane.f32.xlu1 %v2050_v40 }
 0x361   : > { %v1220_v41 = vpop.xlane.xlu0 %1219 }
 0x362   : > { %1707 = vrcp.f32 %v1220_v41 }
 0x363   : > { %v1222_v42 = vpop.xlane.xlu1 %1221 }
 0x364   : > { %1709 = vrcp.f32 %v1222_v42 }
 0x365   : > { %v1216_v45 = vpop.xlane.xlu0 %1215 }
 0x366   : > { %1711 = vrcp.f32 %v1216_v45 }
 0x367   : > { %v1218_v46 = vpop.xlane.xlu1 %1217 }
 0x368   : > { %1713 = vrcp.f32 %v1218_v46 }
 0x36c   : > { %v1708_v47 = vpop.eup %1707 }
 0x36d   : > { %v1252_v48 = vmul.f32 %v1708_v47, %v1997_v60 }
 0x36e   : > { %v1710_v51 = vpop.eup %1709 }
 0x36f   : > { %1281 = vst [vmem:[%s2057_s28 + $0x10] sm:$0xff] %v1252_v48  ;;  %v1254_v52 = vmul.f32 %v1710_v51, %v2000_v2 }
 0x370   : > { %v1712_v53 = vpop.eup %1711 }
 0x371   : > { %1282 = vst [vmem:[%s2057_s28 + $0x18] sm:$0xff] %v1254_v52  ;;  %v1248_v54 = vmul.f32 %v1712_v53, %v2003_v8  ;;  %v1228_v55 = vpop.xlane.xlu0 %1227 }
 0x372   : > { %v1714_v56 = vpop.eup %1713  ;;  %1715 = vrcp.f32 %v1228_v55 }
 0x373   : > { %1279 = vst [vmem:[%s2057_s28] sm:$0xff] %v1248_v54  ;;  %v1250_v57 = vmul.f32 %v1714_v56, %v2006_v43  ;;  %v1230_v58 = vpop.xlane.xlu1 %1229 }
 0x374   : > { %1717 = vrcp.f32 %v1230_v58 }
 0x375   : > { %1280 = vst [vmem:[%s2057_s28 + $0x8] sm:$0xff] %v1250_v57  ;;  %v1224_v60 = vpop.xlane.xlu0 %1223 }
 0x376   : > { %1719 = vrcp.f32 %v1224_v60 }
 0x377   : > { %v1226_v59 = vpop.xlane.xlu1 %1225 }
 0x378   : > { %1721 = vrcp.f32 %v1226_v59 }
 0x37c   : > { %v1716_v2 = vpop.eup %1715 }
 0x37d   : > { %v1260_v8 = vmul.f32 %v1716_v2, %v2013_v36 }
 0x37e   : > { %v1718_v61 = vpop.eup %1717 }
 0x37f   : > { %1285 = vst [vmem:[%s2057_s28 + $0x30] sm:$0xff] %v1260_v8  ;;  %v1262_v62 = vmul.f32 %v1718_v61, %v2016_v44 }
 0x380   : > { %v1720_v63 = vpop.eup %1719 }
 0x381   : > { %1286 = vst [vmem:[%s2057_s28 + $0x38] sm:$0xff] %v1262_v62  ;;  %v1256_v43 = vmul.f32 %v1720_v63, %v2019_v49  ;;  %v1236_v0 = vpop.xlane.xlu0 %1235 }
 0x382   : > { %v1722_v1 = vpop.eup %1721  ;;  %1723 = vrcp.f32 %v1236_v0 }
 0x383   : > { %1283 = vst [vmem:[%s2057_s28 + $0x20] sm:$0xff] %v1256_v43  ;;  %v1258_v3 = vmul.f32 %v1722_v1, %v2022_v50  ;;  %v1238_v4 = vpop.xlane.xlu1 %1237 }
 0x384   : > { %1725 = vrcp.f32 %v1238_v4 }
 0x385   : > { %1284 = vst [vmem:[%s2057_s28 + $0x28] sm:$0xff] %v1258_v3  ;;  %v1232_v36 = vpop.xlane.xlu0 %1231 }
 0x386   : > { %1727 = vrcp.f32 %v1232_v36 }
 0x387   : > { %v1234_v6 = vpop.xlane.xlu1 %1233 }
 0x388   : > { %1729 = vrcp.f32 %v1234_v6 }
 0x38c   : > { %v1724_v44 = vpop.eup %1723 }
 0x38d   : > { %v1268_v49 = vmul.f32 %v1724_v44, %v2029_v17 }
 0x38e   : > { %v1726_v7 = vpop.eup %1725 }
 0x38f   : > { %1289 = vst [vmem:[%s2057_s28 + $0x50] sm:$0xff] %v1268_v49  ;;  %v1270_v9 = vmul.f32 %v1726_v7, %v2032_v5 }
 0x390   : > { %v1728_v10 = vpop.eup %1727 }
 0x391   : > { %1290 = vst [vmem:[%s2057_s28 + $0x58] sm:$0xff] %v1270_v9  ;;  %v1264_v50 = vmul.f32 %v1728_v10, %v2035_v26 }
 0x392   : > { %v1730_v11 = vpop.eup %1729  ;;  %v1240_v12 = vpop.xlane.xlu0 %1239 }
 0x393   : > { %1287 = vst [vmem:[%s2057_s28 + $0x40] sm:$0xff] %v1264_v50  ;;  %v1266_v13 = vmul.f32 %v1730_v11, %v2038_v27  ;;  %1731 = vrcp.f32 %v1240_v12 }
 0x394   : > { %v1242_v14 = vpop.xlane.xlu1 %1241 }
 0x395   : > { %1288 = vst [vmem:[%s2057_s28 + $0x48] sm:$0xff] %v1266_v13  ;;  %1733 = vrcp.f32 %v1242_v14 }
 0x396   : > { %v1244_v15 = vpop.xlane.xlu0 %1243 }
 0x397   : > { %1735 = vrcp.f32 %v1244_v15 }
 0x398   : > { %v1246_v16 = vpop.xlane.xlu1 %1245 }
 0x399   : > { %1737 = vrcp.f32 %v1246_v16 }
 0x39d   : > { %v1732_v17 = vpop.eup %1731 }
 0x39e   : > { %v1272_v18 = vmul.f32 %v1732_v17, %v2041_v33 }
 0x39f   : > { %v1734_v19 = vpop.eup %1733 }
 0x3a0   : > { %1291 = vst [vmem:[%s2057_s28 + $0x60] sm:$0xff] %v1272_v18  ;;  %v1274_v20 = vmul.f32 %v1734_v19, %v2044_v37 }
 0x3a1   : > { %v1736_v21 = vpop.eup %1735 }
 0x3a2   : > { %1292 = vst [vmem:[%s2057_s28 + $0x68] sm:$0xff] %v1274_v20  ;;  %v1276_v22 = vmul.f32 %v1736_v21, %v2047_v39 }
 0x3a3   : > { %v1738_v5 = vpop.eup %1737 }
 0x3a4   : > { %1293 = vst [vmem:[%s2057_s28 + $0x70] sm:$0xff] %v1276_v22  ;;  %v1278_v23 = vmul.f32 %v1738_v5, %v2050_v40 }
 0x3a6   : > { %1294 = vst [vmem:[%s2057_s28 + $0x78] sm:$0xff] %v1278_v23 }
 0x3a7 PF: > { %s19_s27 = sadd.s32 1, %s1745_s27  }
 0x3a8   : > { %p16_p4 = scmp.ge.s32.totalorder %s19_s27, 5  }
 0x3aa   :  { %18 = sbr.rel (!%p16_p4) target bundleno = 1 (0x1), region = 90 }

// kernel: dec_forward.1
= control target key start
LH: loop header
LB: loop body
LE: loop exit
PB: predicated region body
PF: predicated region fallthrough
CT: control target
= control target key end

     0   :  { %s1792_s27 = smov 0   ;;  %s2094_s0 = inlined_call_operand.vmem [shape: bf16[384,256], index: 0, kind: input, shape index: {}]   ;;  %s2095_s1 = inlined_call_operand.vmem [shape: bf16[256,128], index: 1, kind: input, shape index: {}]   ;;  %s2096_s2 = inlined_call_operand.vmem [shape: f32[1,128], index: 2, kind: input, shape index: {}]   ;;  %s2097_s3 = inlined_call_operand.vmem [shape: bf16[128,128], index: 3, kind: input, shape index: {}]   ;;  %s2098_s4 = inlined_call_operand.vmem [shape: f32[1,128], index: 4, kind: input, shape index: {}]   ;;  %s2099_s5 = inlined_call_operand.vmem [shape: bf16[128,128], index: 5, kind: input, shape index: {}]   ;;  %s2100_s6 = inlined_call_operand.vmem [shape: f32[1,128], index: 6, kind: input, shape index: {}]   ;;  %s2101_s7 = inlined_call_operand.vmem [shape: f32[384,128], index: 7, kind: output, shape index: {0}]   ;;  %s2102_s8 = inlined_call_operand.vmem [shape: f32[384,128], index: 8, kind: output, shape index: {1}]  }
   0x1 LB: > { %s1385_s28 = sadd.s32 4294967295, %s1745_s27   ;;  %p1389_p0 = scmp.ge.s32.totalorder %s1745_s27, 1  ;;  %s1745_s27 = sphi %s1792_s27, %s19_s27  }
   0x2   : > { %p267_p1 = scmp.lt.s32.totalorder %s1745_s27, 4 }
   0x4   : > { %p268_p2 = pnand %p1389_p0, %p267_p1 }
   0x5   : > { %v1619_v0 = vld [vmem:[%s2095_s1 + $0x40] sm:$0xff] (!%p268_p2)   ;;  %s1390_s9 = sshll.u32 (!%p268_p2), %s1385_s28, 4  ;;  %v1621_v2 = vld [vmem:[%s2095_s1 + $0x48] sm:$0xff] (!%p268_p2)   ;;  %v1623_v4 = vld [vmem:[%s2095_s1 + $0x50] sm:$0xff] (!%p268_p2)  }
   0x6   : > { %271 = sbr.rel (%p268_p2) target bundleno = 935 (0x3a7), region = 48  ;;  %v1620_v1 = vld [vmem:[%s2095_s1] sm:$0xff] (!%p268_p2)   ;;  %1451 = vmatprep.subr.bf16.mxu0 (!%p268_p2), %v1619_v0  ;;  %v1622_v3 = vld [vmem:[%s2095_s1 + $0x8] sm:$0xff] (!%p268_p2)   ;;  %p308_p3 = scmp.lt.s32.totalorder (!%p268_p2), %s1390_s9, 47  ;;  %v1624_v5 = vld [vmem:[%s2095_s1 + $0x10] sm:$0xff] (!%p268_p2)  }
   0x7   : > { %1452 = vmatpush3.bf16.msra.mxu0 (!%p268_p2), %v1620_v1  ;;  %v1625_v6 = vld [vmem:[%s2095_s1 + $0x58] sm:$0xff] (!%p268_p2)   ;;  %v1627_v8 = vld [vmem:[%s2095_s1 + $0x60] sm:$0xff] (!%p268_p2)   ;;  %v1629_v10 = vld [vmem:[%s2095_s1 + $0x68] sm:$0xff] (!%p268_p2)  }
   0x8   : > { %1453 = vmatprep.subr.bf16.mxu0 (!%p268_p2), %v1621_v2  ;;  %v1626_v7 = vld [vmem:[%s2095_s1 + $0x18] sm:$0xff] (!%p268_p2)   ;;  %v1628_v9 = vld [vmem:[%s2095_s1 + $0x20] sm:$0xff] (!%p268_p2)   ;;  %v1630_v12 = vld [vmem:[%s2095_s1 + $0x28] sm:$0xff] (!%p268_p2)  }
   0x9   : > { %v1631_v13 = vld [vmem:[%s2095_s1 + $0x70] sm:$0xff] (!%p268_p2)   ;;  %v1633_v15 = vld [vmem:[%s2095_s1 + $0x78] sm:$0xff] (!%p268_p2)   ;;  %v1659_v17 = vld [vmem:[%s2097_s3] sm:$0xff] (!%p268_p2)  }
   0xa   : > { %v1632_v14 = vld [vmem:[%s2095_s1 + $0x30] sm:$0xff] (!%p268_p2)   ;;  %v1634_v16 = vld [vmem:[%s2095_s1 + $0x38] sm:$0xff] (!%p268_p2)   ;;  %v1660_v19 = vld [vmem:[%s2097_s3 + $0x8] sm:$0xff] (!%p268_p2)   ;;  %1547 = vmatprep.subr.bf16.mxu1 (!%p268_p2), %v1659_v17 }
   0xb   : > { %1454 = vmatpush3.bf16.msra.mxu0 (!%p268_p2), %v1622_v3  ;;  %v1661_v21 = vld [vmem:[%s2097_s3 + $0x10] sm:$0xff] (!%p268_p2)   ;;  %1548 = vmatpush3.bf16.msra.mxu1 (!%p268_p2), %v1659_v17  ;;  %v1662_v35 = vld [vmem:[%s2097_s3 + $0x18] sm:$0xff] (!%p268_p2)   ;;  %v1663_v36 = vld [vmem:[%s2097_s3 + $0x20] sm:$0xff] (!%p268_p2)  }
   0xc   : > { %1455 = vmatprep.subr.bf16.mxu0 (!%p268_p2), %v1623_v4  ;;  %1549 = vmatprep.subr.bf16.mxu1 (!%p268_p2), %v1660_v19  ;;  %v1664_v37 = vld [vmem:[%s2097_s3 + $0x28] sm:$0xff] (!%p268_p2)   ;;  %v1665_v38 = vld [vmem:[%s2097_s3 + $0x30] sm:$0xff] (!%p268_p2)   ;;  %v1666_v39 = vld [vmem:[%s2097_s3 + $0x38] sm:$0xff] (!%p268_p2)  }
   0xd   : > { %s2104_s9 = smov (!%p308_p3, %s1390_s9), 47  ;;  %v1667_v40 = vld [vmem:[%s2099_s5] sm:$0xff]   ;;  %v1668_v4 = vld [vmem:[%s2099_s5 + $0x8] sm:$0xff]   ;;  %v1670_v17 = vld [vmem:[%s2099_s5 + $0x18] sm:$0xff]  }
   0xe   : > { %s1824_s24 = sshll.u32 %s2104_s9, 3  ;;  %v1902_v43 = vld [vmem:[%s2096_s2] ss:$0 sm:$0xff] }
   0xf   : > { %1456 = vmatpush3.bf16.msra.mxu0 %v1624_v5  ;;  %s1833_s30 = scalar_lea.vmem %s2094_s0, %s1824_s24  ;;  %1550 = vmatpush3.bf16.msra.mxu1 %v1660_v19  ;;  %s1950_s21 = scalar_lea.vmem %s2101_s7, %s1824_s24 }
  0x10   : > { %1457 = vmatprep.subr.bf16.mxu0 %v1625_v6  ;;  %v1637_v11 = vld [vmem:[%s1833_s30 + $0x4] ss:$8 sps:$4 sm:$0xff]   ;;  %v1635_v18 = vld [vmem:[%s1833_s30] ss:$8 sps:$4 sm:$0xff]   ;;  %v1638_v20 = vld [vmem:[%s1833_s30 + $0x14] ss:$8 sps:$4 sm:$0xff]   ;;  %1551 = vmatprep.subr.bf16.mxu1 %v1661_v21  ;;  %s2057_s28 = scalar_lea.vmem %s2102_s8, %s1824_s24 }
  0x11   : > { %590 = vmatprep.mubr.bf16.mxu0 %v1637_v11  ;;  %v1640_v22 = vld [vmem:[%s1833_s30 + $0x10] ss:$8 sps:$4 sm:$0xff]   ;;  %v1641_v23 = vld [vmem:[%s1833_s30 + $0x24] ss:$8 sps:$4 sm:$0xff]   ;;  %v1643_v24 = vld [vmem:[%s1833_s30 + $0x20] ss:$8 sps:$4 sm:$0xff]  }
  0x12   : > { %v1644_v25 = vld [vmem:[%s1833_s30 + $0x34] ss:$8 sps:$4 sm:$0xff]   ;;  %v1646_v26 = vld [vmem:[%s1833_s30 + $0x30] ss:$8 sps:$4 sm:$0xff]   ;;  %v1647_v27 = vld [vmem:[%s1833_s30 + $0x44] ss:$8 sps:$4 sm:$0xff]  }
  0x13   : > { %1458 = vmatpush3.bf16.msra.mxu0 %v1626_v7  ;;  %1552 = vmatpush3.bf16.msra.mxu1 %v1661_v21  ;;  %v1649_v28 = vld [vmem:[%s1833_s30 + $0x40] ss:$8 sps:$4 sm:$0xff]   ;;  %v1650_v29 = vld [vmem:[%s1833_s30 + $0x54] ss:$8 sps:$4 sm:$0xff]   ;;  %v1652_v30 = vld [vmem:[%s1833_s30 + $0x50] ss:$8 sps:$4 sm:$0xff]  }
  0x14   : > { %1459 = vmatprep.subr.bf16.mxu0 %v1627_v8  ;;  %v1653_v31 = vld [vmem:[%s1833_s30 + $0x64] ss:$8 sps:$4 sm:$0xff]   ;;  %v1655_v32 = vld [vmem:[%s1833_s30 + $0x60] ss:$8 sps:$4 sm:$0xff]   ;;  %v1656_v33 = vld [vmem:[%s1833_s30 + $0x74] ss:$8 sps:$4 sm:$0xff]   ;;  %1553 = vmatprep.subr.bf16.mxu1 %v1662_v35 }
  0x15   : > { %v1658_v34 = vld [vmem:[%s1833_s30 + $0x70] ss:$8 sps:$4 sm:$0xff]  }
  0x17   : > { %1460 = vmatpush3.bf16.msra.mxu0 %v1628_v9  ;;  %1554 = vmatpush3.bf16.msra.mxu1 %v1662_v35  ;;  %v1669_v9 = vld [vmem:[%s2099_s5 + $0x10] sm:$0xff]  }
  0x18   : > { %1461 = vmatprep.subr.bf16.mxu0 %v1629_v10  ;;  %1555 = vmatprep.subr.bf16.mxu1 %v1663_v36 }
  0x1b   : > { %1462 = vmatpush3.bf16.msra.mxu0 %v1630_v12  ;;  %1556 = vmatpush3.bf16.msra.mxu1 %v1663_v36 }
  0x1c   : > { %1463 = vmatprep.subr.bf16.mxu0 %v1631_v13  ;;  %1557 = vmatprep.subr.bf16.mxu1 %v1664_v37 }
  0x1f   : > { %1464 = vmatpush3.bf16.msra.mxu0 %v1632_v14  ;;  %1558 = vmatpush3.bf16.msra.mxu1 %v1664_v37 }
  0x20   : > { %1465 = vmatprep.subr.bf16.mxu0 %v1633_v15  ;;  %1559 = vmatprep.subr.bf16.mxu1 %v1665_v38 }
  0x23   : > { %1466 = vmatpush3.bf16.msra.mxu0 %v1634_v16  ;;  %1560 = vmatpush3.bf16.msra.mxu1 %v1665_v38 }
  0x24   : > { %1561 = vmatprep.subr.bf16.mxu1 %v1666_v39 }
  0x26   : > { %591 = vmatmul.mubr.bf16.vlgmr.msra.gmra.mrb[0].mxu0 %v1635_v18 }
  0x27   : > { %598 = vmatprep.mubr.bf16.mxu0 %v1638_v20  ;;  %1562 = vmatpush3.bf16.msra.mxu1 %v1666_v39 }
  0x28   : > { %1579 = vmatprep.subr.bf16.mxu1 %v1667_v40 }
  0x2e   : > { %599 = vmatmul.mubr.bf16.gmra.mrb[4].mxu0 %v1640_v22  ;;  %v1671_v22 = vld [vmem:[%s2099_s5 + $0x20] sm:$0xff]  }
  0x2f   : > { %606 = vmatprep.mubr.bf16.mxu0 %v1641_v23 }
  0x36   : > { %607 = vmatmul.mubr.bf16.gmra.mrb[8].mxu0 %v1643_v24 }
  0x37   : > { %614 = vmatprep.mubr.bf16.mxu0 %v1644_v25 }
  0x3e   : > { %615 = vmatmul.mubr.bf16.gmra.mrb[12].mxu0 %v1646_v26 }
  0x3f   : > { %622 = vmatprep.mubr.bf16.mxu0 %v1647_v27 }
  0x46   : > { %623 = vmatmul.mubr.bf16.gmra.mrb[16].mxu0 %v1649_v28 }
  0x47   : > { %630 = vmatprep.mubr.bf16.mxu0 %v1650_v29 }
  0x4e   : > { %631 = vmatmul.mubr.bf16.gmra.mrb[20].mxu0 %v1652_v30  ;;  %v1672_v30 = vld [vmem:[%s2099_s5 + $0x28] sm:$0xff]  }
  0x4f   : > { %638 = vmatprep.mubr.bf16.mxu0 %v1653_v31 }
  0x56   : > { %639 = vmatmul.mubr.bf16.gmra.mrb[24].mxu0 %v1655_v32 }
  0x57   : > { %646 = vmatprep.mubr.bf16.mxu0 %v1656_v33 }
  0x5e   : > { %647 = vmatmul.mubr.bf16.gmra.mrb[28].mxu0 %v1658_v34 }
  0xf9   : > { %v1467_v41 = vpop.f32.mrb[0].mxu0 }
  0xfa   : > { %v1468_v42 = vpop.f32.mrb[1].mxu0 }
  0xfb   : > { %v1469_v44 = vadd.f32 %v1468_v42, %v1467_v41  ;;  %v1470_v45 = vpop.f32.mrb[2].mxu0 }
  0xfc   : > { %v1471_v46 = vpop.f32.mrb[3].mxu0 }
  0xfd   : > { %v1472_v47 = vadd.f32 %v1471_v46, %v1470_v45  ;;  %v593_v48 = vadd.f32 %v1469_v44, %v1902_v43 }
  0xff   : > { %v596_v49 = vadd.f32 %v1472_v47, %v1902_v43  ;;  %v655_v51 = vmax.f32 %v593_v48, 0.0 }
 0x101   : > { %v1473_v50 = vpop.f32.mrb[4].mxu0  ;;  %v656_v52 = vmax.f32 %v596_v49, 0.0 }
 0x102   : > { %v1474_v53 = vpop.f32.mrb[5].mxu0 }
 0x103   : > { %v1475_v54 = vadd.f32 %v1474_v53, %v1473_v50  ;;  %v1476_v55 = vpop.f32.mrb[6].mxu0  ;;  %v671_v56 = vpack.c.bf16 %v656_v52, %v655_v51 }
 0x104   : > { %v1477_v57 = vpop.f32.mrb[7].mxu0 }
 0x105   : > { %v601_v58 = vadd.f32 %v1475_v54, %v1902_v43  ;;  %v1478_v59 = vadd.f32 %v1477_v57, %v1476_v55  ;;  %1563 = vmatprep.mubr.bf16.mxu1 %v671_v56 }
 0x107   : > { %v604_v60 = vadd.f32 %v1478_v59, %v1902_v43  ;;  %v657_v61 = vmax.f32 %v601_v58, 0.0 }
 0x109   : > { %v658_v62 = vmax.f32 %v604_v60, 0.0  ;;  %v1479_v63 = vpop.f32.mrb[8].mxu0 }
 0x10a   : > { %v1480_v0 = vpop.f32.mrb[9].mxu0 }
 0x10b   : > { %v1481_v1 = vadd.f32 %v1480_v0, %v1479_v63  ;;  %v1482_v2 = vpop.f32.mrb[10].mxu0  ;;  %v672_v3 = vpack.c.bf16 %v658_v62, %v657_v61 }
 0x10c   : > { %v1483_v5 = vpop.f32.mrb[11].mxu0 }
 0x10d   : > { %v609_v6 = vadd.f32 %v1481_v1, %v1902_v43  ;;  %v1484_v7 = vadd.f32 %v1483_v5, %v1482_v2  ;;  %1564 = vmatmul.mubr.bf16.vlgmr.msra.gmra.mrb[0].mxu1 %v672_v3 }
 0x10e   : > { %1580 = vmatpush3.bf16.msra.mxu1 %v1667_v40 }
 0x10f   : > { %v612_v8 = vadd.f32 %v1484_v7, %v1902_v43  ;;  %1581 = vmatprep.subr.bf16.mxu1 %v1668_v4  ;;  %v659_v10 = vmax.f32 %v609_v6, 0.0 }
 0x111   : > { %v660_v11 = vmax.f32 %v612_v8, 0.0  ;;  %v1485_v12 = vpop.f32.mrb[12].mxu0  ;;  %v1673_v8 = vld [vmem:[%s2099_s5 + $0x30] sm:$0xff]  }
 0x112   : > { %v1486_v13 = vpop.f32.mrb[13].mxu0  ;;  %1582 = vmatpush3.bf16.msra.mxu1 %v1668_v4 }
 0x113   : > { %v1487_v14 = vadd.f32 %v1486_v13, %v1485_v12  ;;  %v1488_v15 = vpop.f32.mrb[14].mxu0  ;;  %v673_v16 = vpack.c.bf16 %v660_v11, %v659_v10  ;;  %1583 = vmatprep.subr.bf16.mxu1 %v1669_v9 }
 0x114   : > { %v1489_v18 = vpop.f32.mrb[15].mxu0 }
 0x115   : > { %v617_v19 = vadd.f32 %v1487_v14, %v1902_v43  ;;  %v1490_v20 = vadd.f32 %v1489_v18, %v1488_v15  ;;  %1567 = vmatprep.mubr.bf16.mxu1 %v673_v16 }
 0x116   : > { %1584 = vmatpush3.bf16.msra.mxu1 %v1669_v9  ;;  %v1674_v9 = vld [vmem:[%s2099_s5 + $0x38] sm:$0xff]  }
 0x117   : > { %v620_v21 = vadd.f32 %v1490_v20, %v1902_v43  ;;  %1585 = vmatprep.subr.bf16.mxu1 %v1670_v17  ;;  %v661_v23 = vmax.f32 %v617_v19, 0.0 }
 0x119   : > { %v662_v24 = vmax.f32 %v620_v21, 0.0  ;;  %v1491_v25 = vpop.f32.mrb[16].mxu0 }
 0x11a   : > { %v1492_v26 = vpop.f32.mrb[17].mxu0  ;;  %1586 = vmatpush3.bf16.msra.mxu1 %v1670_v17 }
 0x11b   : > { %v1493_v27 = vadd.f32 %v1492_v26, %v1491_v25  ;;  %v1494_v28 = vpop.f32.mrb[18].mxu0  ;;  %v674_v29 = vpack.c.bf16 %v662_v24, %v661_v23  ;;  %1587 = vmatprep.subr.bf16.mxu1 %v1671_v22 }
 0x11c   : > { %v1495_v31 = vpop.f32.mrb[19].mxu0 }
 0x11d   : > { %v625_v32 = vadd.f32 %v1493_v27, %v1902_v43  ;;  %v1496_v33 = vadd.f32 %v1495_v31, %v1494_v28  ;;  %1568 = vmatmul.mubr.bf16.gmra.mrb[4].mxu1 %v674_v29 }
 0x11e   : > { %1588 = vmatpush3.bf16.msra.mxu1 %v1671_v22 }
 0x11f   : > { %v628_v34 = vadd.f32 %v1496_v33, %v1902_v43  ;;  %1589 = vmatprep.subr.bf16.mxu1 %v1672_v30  ;;  %v663_v35 = vmax.f32 %v625_v32, 0.0 }
 0x121   : > { %v664_v36 = vmax.f32 %v628_v34, 0.0  ;;  %v1497_v37 = vpop.f32.mrb[20].mxu0 }
 0x122   : > { %v1498_v38 = vpop.f32.mrb[21].mxu0  ;;  %1590 = vmatpush3.bf16.msra.mxu1 %v1672_v30 }
 0x123   : > { %v1499_v39 = vadd.f32 %v1498_v38, %v1497_v37  ;;  %v1500_v40 = vpop.f32.mrb[22].mxu0  ;;  %v675_v41 = vpack.c.bf16 %v664_v36, %v663_v35  ;;  %1591 = vmatprep.subr.bf16.mxu1 %v1673_v8 }
 0x124   : > { %v1501_v42 = vpop.f32.mrb[23].mxu0 }
 0x125   : > { %v633_v44 = vadd.f32 %v1499_v39, %v1902_v43  ;;  %v1502_v45 = vadd.f32 %v1501_v42, %v1500_v40  ;;  %1571 = vmatprep.mubr.bf16.mxu1 %v675_v41 }
 0x126   : > { %1592 = vmatpush3.bf16.msra.mxu1 %v1673_v8 }
 0x127   : > { %v636_v46 = vadd.f32 %v1502_v45, %v1902_v43  ;;  %v665_v47 = vmax.f32 %v633_v44, 0.0  ;;  %1593 = vmatprep.subr.bf16.mxu1 %v1674_v9 }
 0x129   : > { %v666_v48 = vmax.f32 %v636_v46, 0.0  ;;  %v1503_v49 = vpop.f32.mrb[24].mxu0 }
 0x12a   : > { %v1504_v50 = vpop.f32.mrb[25].mxu0  ;;  %1594 = vmatpush3.bf16.msra.mxu1 %v1674_v9 }
 0x12b   : > { %v1505_v51 = vadd.f32 %v1504_v50, %v1503_v49  ;;  %v1506_v52 = vpop.f32.mrb[26].mxu0  ;;  %v676_v53 = vpack.c.bf16 %v666_v48, %v665_v47 }
 0x12c   : > { %v1507_v54 = vpop.f32.mrb[27].mxu0 }
 0x12d   : > { %v641_v55 = vadd.f32 %v1505_v51, %v1902_v43  ;;  %v1508_v56 = vadd.f32 %v1507_v54, %v1506_v52  ;;  %1572 = vmatmul.mubr.bf16.gmra.mrb[8].mxu1 %v676_v53 }
 0x12f   : > { %v644_v57 = vadd.f32 %v1508_v56, %v1902_v43  ;;  %v667_v58 = vmax.f32 %v641_v55, 0.0 }
 0x131   : > { %v668_v59 = vmax.f32 %v644_v57, 0.0  ;;  %v1509_v60 = vpop.f32.mrb[28].mxu0 }
 0x132   : > { %v1510_v61 = vpop.f32.mrb[29].mxu0 }
 0x133   : > { %v1511_v62 = vadd.f32 %v1510_v61, %v1509_v60  ;;  %v1512_v63 = vpop.f32.mrb[30].mxu0  ;;  %v677_v0 = vpack.c.bf16 %v668_v59, %v667_v58 }
 0x134   : > { %v1513_v1 = vpop.f32.mrb[31].mxu0 }
 0x135   : > { %v649_v2 = vadd.f32 %v1511_v62, %v1902_v43  ;;  %v1514_v3 = vadd.f32 %v1513_v1, %v1512_v63  ;;  %1575 = vmatprep.mubr.bf16.mxu1 %v677_v0 }
 0x137   : > { %v652_v4 = vadd.f32 %v1514_v3, %v1902_v43  ;;  %v669_v5 = vmax.f32 %v649_v2, 0.0  ;;  %v1944_v43 = vld [vmem:[%s2098_s4] ss:$0 sm:$0xff] }
 0x139   : > { %v670_v6 = vmax.f32 %v652_v4, 0.0 }
 0x13b   : > { %v678_v7 = vpack.c.bf16 %v670_v6, %v669_v5  ;;  %v1987_v5 = vld [vmem:[%s2100_s6] ss:$0 sm:$0xff] }
 0x13d   : > { %1576 = vmatmul.mubr.bf16.gmra.mrb[12].mxu1 %v678_v7 }
 0x1e0   : > { %v1565_v10 = vpop.f32.mrb[0].mxu1 }
 0x1e1   : > { %v793_v11 = vadd.f32 %v1565_v10, %v1944_v43  ;;  %v784_v12 = vpop.f32.mrb[1].mxu1 }
 0x1e2   : > { %v785_v13 = vadd.f32 %v1944_v43, %v784_v12  ;;  %v1566_v14 = vpop.f32.mrb[2].mxu1 }
 0x1e3   : > { %849 = vst [vmem:[%s1950_s21 + $0x10] sm:$0xff] %v793_v11  ;;  %v796_v15 = vadd.f32 %v1566_v14, %v1944_v43  ;;  %v787_v16 = vpop.f32.mrb[3].mxu1  ;;  %v1034_v17 = vmul.f32 %v793_v11, %v793_v11 }
 0x1e4   : > { %847 = vst [vmem:[%s1950_s21] sm:$0xff] %v785_v13  ;;  %v788_v18 = vadd.f32 %v1944_v43, %v787_v16  ;;  %v1032_v19 = vmul.f32 %v785_v13, %v785_v13 }
 0x1e5   : > { %850 = vst [vmem:[%s1950_s21 + $0x18] sm:$0xff] %v796_v15  ;;  %v864_v20 = vpack.c.bf16 %v796_v15, %v793_v11  ;;  %1052 = vadd.xlane.f32.xlu1 %v1034_v17  ;;  %v1035_v22 = vmul.f32 %v796_v15, %v796_v15 }
 0x1e6   : > { %848 = vst [vmem:[%s1950_s21 + $0x8] sm:$0xff] %v788_v18  ;;  %1048 = vadd.xlane.f32.xlu0 %v1032_v19  ;;  %v863_v21 = vpack.c.bf16 %v788_v18, %v785_v13  ;;  %v1033_v23 = vmul.f32 %v788_v18, %v788_v18 }
 0x1e8   : > { %1595 = vmatprep.mubr.bf16.mxu1 %v863_v21 }
 0x1e9   : > { %1054 = vadd.xlane.f32.xlu1 %v1035_v22  ;;  %1596 = vmatmul.mubr.bf16.vlgmr.msra.gmra.mrb[16].mxu1 %v864_v20 }
 0x1ea   : > { %1050 = vadd.xlane.f32.xlu0 %v1033_v23 }
 0x1f0   : > { %v1569_v24 = vpop.f32.mrb[4].mxu1 }
 0x1f1   : > { %v809_v25 = vadd.f32 %v1569_v24, %v1944_v43  ;;  %v800_v26 = vpop.f32.mrb[5].mxu1 }
 0x1f2   : > { %v801_v27 = vadd.f32 %v1944_v43, %v800_v26  ;;  %v1570_v28 = vpop.f32.mrb[6].mxu1 }
 0x1f3   : > { %853 = vst [vmem:[%s1950_s21 + $0x30] sm:$0xff] %v809_v25  ;;  %v812_v29 = vadd.f32 %v1570_v28, %v1944_v43  ;;  %v803_v30 = vpop.f32.mrb[7].mxu1  ;;  %v1038_v31 = vmul.f32 %v809_v25, %v809_v25 }
 0x1f4   : > { %851 = vst [vmem:[%s1950_s21 + $0x20] sm:$0xff] %v801_v27  ;;  %v804_v32 = vadd.f32 %v1944_v43, %v803_v30  ;;  %v1036_v36 = vmul.f32 %v801_v27, %v801_v27 }
 0x1f5   : > { %854 = vst [vmem:[%s1950_s21 + $0x38] sm:$0xff] %v812_v29  ;;  %1060 = vadd.xlane.f32.xlu0 %v1038_v31  ;;  %v1039_v33 = vmul.f32 %v812_v29, %v812_v29  ;;  %v866_v34 = vpack.c.bf16 %v812_v29, %v809_v25 }
 0x1f6   : > { %852 = vst [vmem:[%s1950_s21 + $0x28] sm:$0xff] %v804_v32  ;;  %v865_v35 = vpack.c.bf16 %v804_v32, %v801_v27  ;;  %v1037_v37 = vmul.f32 %v804_v32, %v804_v32 }
 0x1f7   : > { %1062 = vadd.xlane.f32.xlu1 %v1039_v33 }
 0x1f8   : > { %1599 = vmatprep.mubr.bf16.mxu1 %v865_v35 }
 0x1f9   : > { %1056 = vadd.xlane.f32.xlu0 %v1036_v36  ;;  %1600 = vmatmul.mubr.bf16.gmra.mrb[20].mxu1 %v866_v34 }
 0x1fb   : > { %1058 = vadd.xlane.f32.xlu1 %v1037_v37 }
 0x200   : > { %v1573_v38 = vpop.f32.mrb[8].mxu1 }
 0x201   : > { %v825_v39 = vadd.f32 %v1573_v38, %v1944_v43  ;;  %v816_v40 = vpop.f32.mrb[9].mxu1 }
 0x202   : > { %v817_v41 = vadd.f32 %v1944_v43, %v816_v40  ;;  %v1574_v42 = vpop.f32.mrb[10].mxu1 }
 0x203   : > { %857 = vst [vmem:[%s1950_s21 + $0x50] sm:$0xff] %v825_v39  ;;  %v828_v44 = vadd.f32 %v1574_v42, %v1944_v43  ;;  %v819_v45 = vpop.f32.mrb[11].mxu1  ;;  %v1042_v46 = vmul.f32 %v825_v39, %v825_v39 }
 0x204   : > { %855 = vst [vmem:[%s1950_s21 + $0x40] sm:$0xff] %v817_v41  ;;  %v820_v47 = vadd.f32 %v1944_v43, %v819_v45  ;;  %v1040_v51 = vmul.f32 %v817_v41, %v817_v41 }
 0x205   : > { %858 = vst [vmem:[%s1950_s21 + $0x58] sm:$0xff] %v828_v44  ;;  %1068 = vadd.xlane.f32.xlu0 %v1042_v46  ;;  %v1043_v48 = vmul.f32 %v828_v44, %v828_v44  ;;  %v868_v49 = vpack.c.bf16 %v828_v44, %v825_v39 }
 0x206   : > { %856 = vst [vmem:[%s1950_s21 + $0x48] sm:$0xff] %v820_v47  ;;  %v867_v50 = vpack.c.bf16 %v820_v47, %v817_v41  ;;  %v1041_v52 = vmul.f32 %v820_v47, %v820_v47 }
 0x207   : > { %1070 = vadd.xlane.f32.xlu1 %v1043_v48 }
 0x208   : > { %1603 = vmatprep.mubr.bf16.mxu1 %v867_v50 }
 0x209   : > { %1064 = vadd.xlane.f32.xlu0 %v1040_v51  ;;  %1604 = vmatmul.mubr.bf16.gmra.mrb[24].mxu1 %v868_v49 }
 0x20b   : > { %1066 = vadd.xlane.f32.xlu1 %v1041_v52 }
 0x210   : > { %v1577_v53 = vpop.f32.mrb[12].mxu1 }
 0x211   : > { %v841_v54 = vadd.f32 %v1577_v53, %v1944_v43  ;;  %v832_v55 = vpop.f32.mrb[13].mxu1 }
 0x212   : > { %v833_v56 = vadd.f32 %v1944_v43, %v832_v55  ;;  %v1578_v57 = vpop.f32.mrb[14].mxu1 }
 0x213   : > { %861 = vst [vmem:[%s1950_s21 + $0x70] sm:$0xff] %v841_v54  ;;  %v844_v58 = vadd.f32 %v1578_v57, %v1944_v43  ;;  %v835_v59 = vpop.f32.mrb[15].mxu1  ;;  %v1046_v1 = vmul.f32 %v841_v54, %v841_v54 }
 0x214   : > { %859 = vst [vmem:[%s1950_s21 + $0x60] sm:$0xff] %v833_v56  ;;  %v836_v60 = vadd.f32 %v1944_v43, %v835_v59  ;;  %v1044_v61 = vmul.f32 %v833_v56, %v833_v56 }
 0x215   : > { %862 = vst [vmem:[%s1950_s21 + $0x78] sm:$0xff] %v844_v58  ;;  %v870_v62 = vpack.c.bf16 %v844_v58, %v841_v54  ;;  %v1047_v2 = vmul.f32 %v844_v58, %v844_v58 }
 0x216   : > { %860 = vst [vmem:[%s1950_s21 + $0x68] sm:$0xff] %v836_v60  ;;  %1072 = vadd.xlane.f32.xlu0 %v1044_v61  ;;  %v1045_v63 = vmul.f32 %v836_v60, %v836_v60  ;;  %v869_v0 = vpack.c.bf16 %v836_v60, %v833_v56 }
 0x218   : > { %1074 = vadd.xlane.f32.xlu1 %v1045_v63  ;;  %1607 = vmatprep.mubr.bf16.mxu1 %v869_v0 }
 0x219   : > { %1608 = vmatmul.mubr.bf16.gmra.mrb[28].mxu1 %v870_v62 }
 0x21a   : > { %1076 = vadd.xlane.f32.xlu0 %v1046_v1 }
 0x21c   : > { %1078 = vadd.xlane.f32.xlu1 %v1047_v2 }
 0x272   : > { %v1053_v3 = vpop.xlane.xlu1 %1052 }
 0x273   : > { %v1049_v4 = vpop.xlane.xlu0 %1048  ;;  %v1089_v8 = vadd.f32 %v1987_v5, %v1053_v3 }
 0x274   : > { %v1087_v11 = vadd.f32 %v1987_v5, %v1049_v4 }
 0x276   : > { %v1055_v6 = vpop.xlane.xlu1 %1054 }
 0x277   : > { %v1051_v9 = vpop.xlane.xlu0 %1050  ;;  %v1090_v14 = vadd.f32 %v1987_v5, %v1055_v6 }
 0x278   : > { %v1088_v18 = vadd.f32 %v1987_v5, %v1051_v9 }
 0x282   : > { %v1061_v29 = vpop.xlane.xlu0 %1060 }
 0x283   : > { %v1093_v35 = vadd.f32 %v1987_v5, %v1061_v29 }
 0x284   : > { %v1063_v32 = vpop.xlane.xlu1 %1062 }
 0x285   : > { %v1094_v44 = vadd.f32 %v1987_v5, %v1063_v32 }
 0x286   : > { %v1057_v33 = vpop.xlane.xlu0 %1056 }
 0x287   : > { %v1091_v39 = vadd.f32 %v1987_v5, %v1057_v33 }
 0x288   : > { %v1059_v36 = vpop.xlane.xlu1 %1058 }
 0x289   : > { %v1092_v49 = vadd.f32 %v1987_v5, %v1059_v36 }
 0x292   : > { %v1069_v4 = vpop.xlane.xlu0 %1068 }
 0x294   : > { %v1071_v9 = vpop.xlane.xlu1 %1070 }
 0x2bc   : > { %v1597_v7 = vpop.f32.mrb[16].mxu1 }
 0x2bd   : > { %v1105_v43 = vmul.f32 2.0, %v1597_v7  ;;  %v969_v10 = vpop.f32.mrb[17].mxu1 }
 0x2be   : > { %v1103_v12 = vmul.f32 2.0, %v969_v10  ;;  %v1598_v13 = vpop.f32.mrb[18].mxu1  ;;  %v1065_v10 = vpop.xlane.xlu0 %1064 }
 0x2bf   : > { %v1121_v15 = vsub.f32 %v1089_v8, %v1105_v43  ;;  %v1106_v16 = vmul.f32 2.0, %v1598_v13  ;;  %v972_v17 = vpop.f32.mrb[19].mxu1  ;;  %v1067_v13 = vpop.xlane.xlu1 %1066 }
 0x2c0   : > { %v1119_v19 = vsub.f32 %v1087_v11, %v1103_v12  ;;  %v1104_v20 = vmul.f32 2.0, %v972_v17  ;;  %v1097_v12 = vadd.f32 %v1987_v5, %v1069_v4 }
 0x2c1   : > { %v1137_v21 = vmax.f32 %v1121_v15, 0.0  ;;  %v1122_v22 = vsub.f32 %v1090_v14, %v1106_v16  ;;  %v1095_v16 = vadd.f32 %v1987_v5, %v1065_v10 }
 0x2c2   : > { %v1135_v23 = vmax.f32 %v1119_v19, 0.0  ;;  %v1120_v24 = vsub.f32 %v1088_v18, %v1104_v20  ;;  %v1098_v20 = vadd.f32 %v1987_v5, %v1071_v9 }
 0x2c3   : > { %v1153_v25 = vadd.f32 1.0, %v1137_v21  ;;  %v1138_v26 = vmax.f32 %v1122_v22, 0.0 }
 0x2c4   : > { %v1151_v27 = vadd.f32 1.0, %v1135_v23  ;;  %v1136_v28 = vmax.f32 %v1120_v24, 0.0 }
 0x2c5   : > { %1675 = vrsqrt.f32 %v1153_v25  ;;  %v1154_v30 = vadd.f32 1.0, %v1138_v26  ;;  %v1096_v25 = vadd.f32 %v1987_v5, %v1067_v13 }
 0x2c6   : > { %1677 = vrsqrt.f32 %v1151_v27  ;;  %v1152_v31 = vadd.f32 1.0, %v1136_v28 }
 0x2c7   : > { %1679 = vrsqrt.f32 %v1154_v30 }
 0x2c8   : > { %1681 = vrsqrt.f32 %v1152_v31 }
 0x2cc   : > { %v1601_v34 = vpop.f32.mrb[20].mxu1 }
 0x2cd   : > { %v1109_v37 = vmul.f32 2.0, %v1601_v34  ;;  %v985_v38 = vpop.f32.mrb[21].mxu1 }
 0x2ce   : > { %v1107_v40 = vmul.f32 2.0, %v985_v38  ;;  %v1602_v41 = vpop.f32.mrb[22].mxu1 }
 0x2cf   : > { %v1676_v42 = vpop.eup %1675  ;;  %v1125_v45 = vsub.f32 %v1093_v35, %v1109_v37  ;;  %v1110_v46 = vmul.f32 2.0, %v1602_v41  ;;  %v988_v47 = vpop.f32.mrb[23].mxu1 }
 0x2d0   : > { %v1678_v48 = vpop.eup %1677  ;;  %v1123_v50 = vsub.f32 %v1091_v39, %v1107_v40  ;;  %v1108_v51 = vmul.f32 2.0, %v988_v47  ;;  %v1185_v52 = vmul.f32 %v1676_v42, %v1676_v42  ;;  %v1073_v40 = vpop.xlane.xlu0 %1072 }
 0x2d1   : > { %v1680_v53 = vpop.eup %1679  ;;  %v1141_v54 = vmax.f32 %v1125_v45, 0.0  ;;  %v1126_v55 = vsub.f32 %v1094_v44, %v1110_v46  ;;  %v1183_v56 = vmul.f32 %v1678_v48, %v1678_v48  ;;  %v1075_v47 = vpop.xlane.xlu1 %1074 }
 0x2d2   : > { %v1682_v57 = vpop.eup %1681  ;;  %v1139_v58 = vmax.f32 %v1123_v50, 0.0  ;;  %v1124_v59 = vsub.f32 %v1092_v49, %v1108_v51  ;;  %v1997_v60 = vmul.f32 %v1676_v42, %v1185_v52  ;;  %v1186_v61 = vmul.f32 %v1680_v53, %v1680_v53 }
 0x2d3   : > { %v1157_v62 = vadd.f32 1.0, %v1141_v54  ;;  %v1142_v63 = vmax.f32 %v1126_v55, 0.0  ;;  %v1184_v3 = vmul.f32 %v1682_v57, %v1682_v57  ;;  %v2003_v8 = vmul.f32 %v1678_v48, %v1183_v56 }
 0x2d4   : > { %v1155_v0 = vadd.f32 1.0, %v1139_v58  ;;  %v1140_v1 = vmax.f32 %v1124_v59, 0.0  ;;  %1219 = vadd.xlane.f32.xlu0 %v1997_v60  ;;  %v2000_v2 = vmul.f32 %v1680_v53, %v1186_v61  ;;  %v1077_v51 = vpop.xlane.xlu0 %1076  ;;  %v1100_v4 = vadd.f32 %v1987_v5, %v1075_v47 }
 0x2d5   : > { %1683 = vrsqrt.f32 %v1157_v62  ;;  %v1158_v6 = vadd.f32 1.0, %v1142_v63  ;;  %v2006_v43 = vmul.f32 %v1682_v57, %v1184_v3  ;;  %v1079_v52 = vpop.xlane.xlu1 %1078  ;;  %v1101_v54 = vadd.f32 %v1987_v5, %v1077_v51 }
 0x2d6   : > { %1685 = vrsqrt.f32 %v1155_v0  ;;  %v1156_v7 = vadd.f32 1.0, %v1140_v1  ;;  %1221 = vadd.xlane.f32.xlu1 %v2000_v2  ;;  %v1099_v57 = vadd.f32 %v1987_v5, %v1073_v40  ;;  %v1102_v62 = vadd.f32 %v1987_v5, %v1079_v52 }
 0x2d7   : > { %1687 = vrsqrt.f32 %v1158_v6 }
 0x2d8   : > { %1689 = vrsqrt.f32 %v1156_v7  ;;  %1215 = vadd.xlane.f32.xlu0 %v2003_v8 }
 0x2da   : > { %1217 = vadd.xlane.f32.xlu1 %v2006_v43 }
 0x2dc   : > { %v1605_v11 = vpop.f32.mrb[24].mxu1 }
 0x2dd   : > { %v1113_v14 = vmul.f32 2.0, %v1605_v11  ;;  %v1001_v15 = vpop.f32.mrb[25].mxu1 }
 0x2de   : > { %v1111_v17 = vmul.f32 2.0, %v1001_v15  ;;  %v1606_v18 = vpop.f32.mrb[26].mxu1 }
 0x2df   : > { %v1684_v19 = vpop.eup %1683  ;;  %v1129_v21 = vsub.f32 %v1097_v12, %v1113_v14  ;;  %v1114_v22 = vmul.f32 2.0, %v1606_v18  ;;  %v1004_v23 = vpop.f32.mrb[27].mxu1 }
 0x2e0   : > { %v1686_v24 = vpop.eup %1685  ;;  %v1127_v26 = vsub.f32 %v1095_v16, %v1111_v17  ;;  %v1112_v27 = vmul.f32 2.0, %v1004_v23  ;;  %v1189_v28 = vmul.f32 %v1684_v19, %v1684_v19 }
 0x2e1   : > { %v1688_v29 = vpop.eup %1687  ;;  %v1145_v30 = vmax.f32 %v1129_v21, 0.0  ;;  %v1130_v31 = vsub.f32 %v1098_v20, %v1114_v22  ;;  %v1187_v32 = vmul.f32 %v1686_v24, %v1686_v24 }
 0x2e2   : > { %v1690_v33 = vpop.eup %1689  ;;  %v1143_v34 = vmax.f32 %v1127_v26, 0.0  ;;  %v1128_v35 = vsub.f32 %v1096_v25, %v1112_v27  ;;  %v2013_v36 = vmul.f32 %v1684_v19, %v1189_v28  ;;  %v1190_v37 = vmul.f32 %v1688_v29, %v1688_v29 }
 0x2e3   : > { %v1161_v38 = vadd.f32 1.0, %v1145_v30  ;;  %v1146_v39 = vmax.f32 %v1130_v31, 0.0  ;;  %v1188_v45 = vmul.f32 %v1690_v33, %v1690_v33  ;;  %v2019_v49 = vmul.f32 %v1686_v24, %v1187_v32 }
 0x2e4   : > { %v1159_v41 = vadd.f32 1.0, %v1143_v34  ;;  %v1144_v42 = vmax.f32 %v1128_v35, 0.0  ;;  %1227 = vadd.xlane.f32.xlu0 %v2013_v36  ;;  %v2016_v44 = vmul.f32 %v1688_v29, %v1190_v37 }
 0x2e5   : > { %1691 = vrsqrt.f32 %v1161_v38  ;;  %v1162_v46 = vadd.f32 1.0, %v1146_v39  ;;  %v2022_v50 = vmul.f32 %v1690_v33, %v1188_v45 }
 0x2e6   : > { %1693 = vrsqrt.f32 %v1159_v41  ;;  %v1160_v48 = vadd.f32 1.0, %v1144_v42  ;;  %1229 = vadd.xlane.f32.xlu1 %v2016_v44 }
 0x2e7   : > { %1695 = vrsqrt.f32 %v1162_v46 }
 0x2e8   : > { %1697 = vrsqrt.f32 %v1160_v48  ;;  %1223 = vadd.xlane.f32.xlu0 %v2019_v49 }
 0x2ea   : > { %1225 = vadd.xlane.f32.xlu1 %v2022_v50 }
 0x2ec   : > { %v1609_v53 = vpop.f32.mrb[28].mxu1 }
 0x2ed   : > { %v1117_v55 = vmul.f32 2.0, %v1609_v53  ;;  %v1017_v56 = vpop.f32.mrb[29].mxu1 }
 0x2ee   : > { %v1115_v58 = vmul.f32 2.0, %v1017_v56  ;;  %v1610_v59 = vpop.f32.mrb[30].mxu1 }
 0x2ef   : > { %v1692_v61 = vpop.eup %1691  ;;  %v1133_v63 = vsub.f32 %v1101_v54, %v1117_v55  ;;  %v1118_v0 = vmul.f32 2.0, %v1610_v59  ;;  %v1020_v1 = vpop.f32.mrb[31].mxu1 }
 0x2f0   : > { %v1694_v3 = vpop.eup %1693  ;;  %v1131_v6 = vsub.f32 %v1099_v57, %v1115_v58  ;;  %v1116_v7 = vmul.f32 2.0, %v1020_v1  ;;  %v1193_v9 = vmul.f32 %v1692_v61, %v1692_v61 }
 0x2f1   : > { %v1696_v10 = vpop.eup %1695  ;;  %v1149_v11 = vmax.f32 %v1133_v63, 0.0  ;;  %v1134_v12 = vsub.f32 %v1102_v62, %v1118_v0  ;;  %v1191_v13 = vmul.f32 %v1694_v3, %v1694_v3 }
 0x2f2   : > { %v1698_v14 = vpop.eup %1697  ;;  %v1147_v15 = vmax.f32 %v1131_v6, 0.0  ;;  %v1132_v16 = vsub.f32 %v1100_v4, %v1116_v7  ;;  %v2029_v17 = vmul.f32 %v1692_v61, %v1193_v9  ;;  %v1194_v18 = vmul.f32 %v1696_v10, %v1696_v10 }
 0x2f3   : > { %v1165_v19 = vadd.f32 1.0, %v1149_v11  ;;  %v1150_v20 = vmax.f32 %v1134_v12, 0.0  ;;  %v1192_v23 = vmul.f32 %v1698_v14, %v1698_v14  ;;  %v2035_v26 = vmul.f32 %v1694_v3, %v1191_v13 }
 0x2f4   : > { %v1163_v21 = vadd.f32 1.0, %v1147_v15  ;;  %v1148_v22 = vmax.f32 %v1132_v16, 0.0  ;;  %1235 = vadd.xlane.f32.xlu0 %v2029_v17  ;;  %v2032_v5 = vmul.f32 %v1696_v10, %v1194_v18 }
 0x2f5   : > { %1699 = vrsqrt.f32 %v1165_v19  ;;  %v1166_v24 = vadd.f32 1.0, %v1150_v20  ;;  %v2038_v27 = vmul.f32 %v1698_v14, %v1192_v23 }
 0x2f6   : > { %1701 = vrsqrt.f32 %v1163_v21  ;;  %v1164_v25 = vadd.f32 1.0, %v1148_v22  ;;  %1237 = vadd.xlane.f32.xlu1 %v2032_v5 }
 0x2f7   : > { %1703 = vrsqrt.f32 %v1166_v24 }
 0x2f8   : > { %1705 = vrsqrt.f32 %v1164_v25  ;;  %1231 = vadd.xlane.f32.xlu0 %v2035_v26 }
 0x2fa   : > { %1233 = vadd.xlane.f32.xlu1 %v2038_v27 }
 0x2ff   : > { %v1700_v28 = vpop.eup %1699 }
 0x300   : > { %v1702_v29 = vpop.eup %1701  ;;  %v1197_v35 = vmul.f32 %v1700_v28, %v1700_v28 }
 0x301   : > { %v1704_v30 = vpop.eup %1703  ;;  %v1195_v31 = vmul.f32 %v1702_v29, %v1702_v29 }
 0x302   : > { %v1706_v32 = vpop.eup %1705  ;;  %v1198_v38 = vmul.f32 %v1704_v30, %v1704_v30  ;;  %v2047_v39 = vmul.f32 %v1700_v28, %v1197_v35 }
 0x303   : > { %v2041_v33 = vmul.f32 %v1702_v29, %v1195_v31  ;;  %v1196_v34 = vmul.f32 %v1706_v32, %v1706_v32 }
 0x304   : > { %v2050_v40 = vmul.f32 %v1704_v30, %v1198_v38 }
 0x305   : > { %1239 = vadd.xlane.f32.xlu0 %v2041_v33  ;;  %v2044_v37 = vmul.f32 %v1706_v32, %v1196_v34 }
 0x307   : > { %1241 = vadd.xlane.f32.xlu1 %v2044_v37 }
 0x309   : > { %1243 = vadd.xlane.f32.xlu0 %v2047_v39 }
 0x30b   : > { %1245 = vadd.xlane.f32.xlu1 %v2050_v40 }
 0x361   : > { %v1220_v41 = vpop.xlane.xlu0 %1219 }
 0x362   : > { %1707 = vrcp.f32 %v1220_v41 }
 0x363   : > { %v1222_v42 = vpop.xlane.xlu1 %1221 }
 0x364   : > { %1709 = vrcp.f32 %v1222_v42 }
 0x365   : > { %v1216_v45 = vpop.xlane.xlu0 %1215 }
 0x366   : > { %1711 = vrcp.f32 %v1216_v45 }
 0x367   : > { %v1218_v46 = vpop.xlane.xlu1 %1217 }
 0x368   : > { %1713 = vrcp.f32 %v1218_v46 }
 0x36c   : > { %v1708_v47 = vpop.eup %1707 }
 0x36d   : > { %v1252_v48 = vmul.f32 %v1708_v47, %v1997_v60 }
 0x36e   : > { %v1710_v51 = vpop.eup %1709 }
 0x36f   : > { %1281 = vst [vmem:[%s2057_s28 + $0x10] sm:$0xff] %v1252_v48  ;;  %v1254_v52 = vmul.f32 %v1710_v51, %v2000_v2 }
 0x370   : > { %v1712_v53 = vpop.eup %1711 }
 0x371   : > { %1282 = vst [vmem:[%s2057_s28 + $0x18] sm:$0xff] %v1254_v52  ;;  %v1248_v54 = vmul.f32 %v1712_v53, %v2003_v8  ;;  %v1228_v55 = vpop.xlane.xlu0 %1227 }
 0x372   : > { %v1714_v56 = vpop.eup %1713  ;;  %1715 = vrcp.f32 %v1228_v55 }
 0x373   : > { %1279 = vst [vmem:[%s2057_s28] sm:$0xff] %v1248_v54  ;;  %v1250_v57 = vmul.f32 %v1714_v56, %v2006_v43  ;;  %v1230_v58 = vpop.xlane.xlu1 %1229 }
 0x374   : > { %1717 = vrcp.f32 %v1230_v58 }
 0x375   : > { %1280 = vst [vmem:[%s2057_s28 + $0x8] sm:$0xff] %v1250_v57  ;;  %v1224_v60 = vpop.xlane.xlu0 %1223 }
 0x376   : > { %1719 = vrcp.f32 %v1224_v60 }
 0x377   : > { %v1226_v59 = vpop.xlane.xlu1 %1225 }
 0x378   : > { %1721 = vrcp.f32 %v1226_v59 }
 0x37c   : > { %v1716_v2 = vpop.eup %1715 }
 0x37d   : > { %v1260_v8 = vmul.f32 %v1716_v2, %v2013_v36 }
 0x37e   : > { %v1718_v61 = vpop.eup %1717 }
 0x37f   : > { %1285 = vst [vmem:[%s2057_s28 + $0x30] sm:$0xff] %v1260_v8  ;;  %v1262_v62 = vmul.f32 %v1718_v61, %v2016_v44 }
 0x380   : > { %v1720_v63 = vpop.eup %1719 }
 0x381   : > { %1286 = vst [vmem:[%s2057_s28 + $0x38] sm:$0xff] %v1262_v62  ;;  %v1256_v43 = vmul.f32 %v1720_v63, %v2019_v49  ;;  %v1236_v0 = vpop.xlane.xlu0 %1235 }
 0x382   : > { %v1722_v1 = vpop.eup %1721  ;;  %1723 = vrcp.f32 %v1236_v0 }
 0x383   : > { %1283 = vst [vmem:[%s2057_s28 + $0x20] sm:$0xff] %v1256_v43  ;;  %v1258_v3 = vmul.f32 %v1722_v1, %v2022_v50  ;;  %v1238_v4 = vpop.xlane.xlu1 %1237 }
 0x384   : > { %1725 = vrcp.f32 %v1238_v4 }
 0x385   : > { %1284 = vst [vmem:[%s2057_s28 + $0x28] sm:$0xff] %v1258_v3  ;;  %v1232_v36 = vpop.xlane.xlu0 %1231 }
 0x386   : > { %1727 = vrcp.f32 %v1232_v36 }
 0x387   : > { %v1234_v6 = vpop.xlane.xlu1 %1233 }
 0x388   : > { %1729 = vrcp.f32 %v1234_v6 }
 0x38c   : > { %v1724_v44 = vpop.eup %1723 }
 0x38d   : > { %v1268_v49 = vmul.f32 %v1724_v44, %v2029_v17 }
 0x38e   : > { %v1726_v7 = vpop.eup %1725 }
 0x38f   : > { %1289 = vst [vmem:[%s2057_s28 + $0x50] sm:$0xff] %v1268_v49  ;;  %v1270_v9 = vmul.f32 %v1726_v7, %v2032_v5 }
 0x390   : > { %v1728_v10 = vpop.eup %1727 }
 0x391   : > { %1290 = vst [vmem:[%s2057_s28 + $0x58] sm:$0xff] %v1270_v9  ;;  %v1264_v50 = vmul.f32 %v1728_v10, %v2035_v26 }
 0x392   : > { %v1730_v11 = vpop.eup %1729  ;;  %v1240_v12 = vpop.xlane.xlu0 %1239 }
 0x393   : > { %1287 = vst [vmem:[%s2057_s28 + $0x40] sm:$0xff] %v1264_v50  ;;  %v1266_v13 = vmul.f32 %v1730_v11, %v2038_v27  ;;  %1731 = vrcp.f32 %v1240_v12 }
 0x394   : > { %v1242_v14 = vpop.xlane.xlu1 %1241 }
 0x395   : > { %1288 = vst [vmem:[%s2057_s28 + $0x48] sm:$0xff] %v1266_v13  ;;  %1733 = vrcp.f32 %v1242_v14 }
 0x396   : > { %v1244_v15 = vpop.xlane.xlu0 %1243 }
 0x397   : > { %1735 = vrcp.f32 %v1244_v15 }
 0x398   : > { %v1246_v16 = vpop.xlane.xlu1 %1245 }
 0x399   : > { %1737 = vrcp.f32 %v1246_v16 }
 0x39d   : > { %v1732_v17 = vpop.eup %1731 }
 0x39e   : > { %v1272_v18 = vmul.f32 %v1732_v17, %v2041_v33 }
 0x39f   : > { %v1734_v19 = vpop.eup %1733 }
 0x3a0   : > { %1291 = vst [vmem:[%s2057_s28 + $0x60] sm:$0xff] %v1272_v18  ;;  %v1274_v20 = vmul.f32 %v1734_v19, %v2044_v37 }
 0x3a1   : > { %v1736_v21 = vpop.eup %1735 }
 0x3a2   : > { %1292 = vst [vmem:[%s2057_s28 + $0x68] sm:$0xff] %v1274_v20  ;;  %v1276_v22 = vmul.f32 %v1736_v21, %v2047_v39 }
 0x3a3   : > { %v1738_v5 = vpop.eup %1737 }
 0x3a4   : > { %1293 = vst [vmem:[%s2057_s28 + $0x70] sm:$0xff] %v1276_v22  ;;  %v1278_v23 = vmul.f32 %v1738_v5, %v2050_v40 }
 0x3a6   : > { %1294 = vst [vmem:[%s2057_s28 + $0x78] sm:$0xff] %v1278_v23 }
 0x3a7 PF: > { %s19_s27 = sadd.s32 1, %s1745_s27  }
 0x3a8   : > { %p16_p4 = scmp.ge.s32.totalorder %s19_s27, 5  }
 0x3aa   :  { %18 = sbr.rel (!%p16_p4) target bundleno = 1 (0x1), region = 90 }

</bundles_post_ra>
